<compile_context>
chip_gen: v7x
topology: tpu7x:2x2x1
jax: 0.10.0
libtpu: 0.0.40
codegen_flags: <defaults>
</compile_context>

<pallas_src>
import jax
import jax.numpy as jnp
import numpy as np
from jax.experimental import pallas as pl
from jax.experimental.pallas import tpu as pltpu

_OUT_NAMES = ("shift_msa", "scale_msa", "gate_msa", "shift_mlp", "scale_mlp", "gate_mlp")


def cond_injection_kernel(a_ref, t_ref, w_bead_ref, b_bead_ref, w_ada_ref, b_ada_ref, out_ref):
    # c = bead_project(a) + t    -- bf16 MXU matmul, f32 accumulation / elementwise math.
    a_bf = a_ref[...].astype(jnp.bfloat16)
    c = (
        jnp.dot(a_bf, w_bead_ref[...], preferred_element_type=jnp.float32)
        + b_bead_ref[...]
        + t_ref[...].astype(jnp.float32)
    )

    # SiLU(c) = c * sigmoid(c); exp -> EUP, reciprocal -> EUP (approx), keeps VALU free.
    s = c * pl.reciprocal(1.0 + jnp.exp(-c), approx=True)
    s_bf = s.astype(jnp.bfloat16)

    # Six lane-dense (rows, D) matmuls instead of one (rows, 6D) matmul + lane slicing.
    for j in range(6):  # static unroll: 6 MXU pushes + 6 lane-dense stores
        out_ref[j] = (
            jnp.dot(s_bf, w_ada_ref[j], preferred_element_type=jnp.float32) + b_ada_ref[j]
        ).astype(out_ref.dtype)


def _pick_row_block(n, row_block):
    """Largest row tile <= row_block that divides n (prefer multiples of 8)."""
    rb = min(row_block, n)
    while rb > 8 and (n % rb != 0 or rb % 8 != 0):
        rb -= 8
    if n % rb != 0:
        rb = n
    return rb


def conditional_injection_adanorm(a, t, params, *, row_block=256):
    """a: (B, S, bead_embed_dim) f32, t: (B, S, time_embed_dim) f32.

    params:
      w_bead: (bead_dim, time_dim) bf16   b_bead: (1, time_dim) f32
      w_ada : (6, time_dim, embed_dim) bf16   b_ada: (6, 1, embed_dim) f32
    Returns dict of the 6 modulation tensors, each (B, S, embed_dim) f32.
    """
    B, S, A = a.shape
    T = t.shape[-1]
    D = params["w_ada"].shape[-1]
    N = B * S

    a2 = a.reshape(N, A)
    t2 = t.reshape(N, T)

    rb = _pick_row_block(N, row_block)
    grid = (N // rb,)

    def row_spec(cols):
        return pl.BlockSpec((rb, cols), lambda i: (i, 0))

    def whole(*dims):
        nd = len(dims)
        return pl.BlockSpec(dims, lambda i: (0,) * nd)

    # Advisory cost estimate for the XLA scheduler.
    weight_bytes = sum(int(v.size) * v.dtype.itemsize for v in params.values())
    cost = pl.CostEstimate(
        flops=2 * N * (A * T + 6 * T * D),
        transcendentals=N * T,                      # one exp per element of c
        bytes_accessed=(a2.size * a2.dtype.itemsize + t2.size * t2.dtype.itemsize
                        + weight_bytes + 6 * N * D * 4),
    )

    out = pl.pallas_call(
        cond_injection_kernel,
        out_shape=jax.ShapeDtypeStruct((6, N, D), jnp.float32),
        grid_spec=pltpu.PrefetchScalarGridSpec(
            num_scalar_prefetch=0,
            grid=grid,
            in_specs=[
                row_spec(A),          # a rows
                row_spec(T),          # t rows
                whole(A, T),          # bead_project weight (bf16), resident
                whole(1, T),          # bead_project bias   (f32)
                whole(6, T, D),       # adaLN weights, pre-split into 6 (bf16), resident
                whole(6, 1, D),       # adaLN biases, pre-split into 6 (f32)
            ],
            out_specs=pl.BlockSpec((6, rb, D), lambda i: (0, i, 0)),
        ),
        compiler_params=pltpu.CompilerParams(
            dimension_semantics=("parallel",),
            vmem_limit_bytes=48 * 1024 * 1024,
        ),
        cost_estimate=cost,
    )(a2, t2, params["w_bead"], params["b_bead"], params["w_ada"], params["b_ada"])

    ada = out.reshape(6, B, S, D)
    return {name: ada[i] for i, name in enumerate(_OUT_NAMES)}


def init_params(key, bead_embed_dim, time_embed_dim, embed_dim):
    """nn.Linear-style init. Weights stored transposed (in, out) and in bf16 for the MXU.

    The PyTorch (6*embed_dim, time_dim) adaLN weight maps to w_ada via
    W.T.reshape(time_dim, 6, embed_dim).transpose(1, 0, 2)  -> (6, time_dim, embed_dim).
    mode='adanorm' (not 'adanorm_fix'), so adaLN weights stay non-zero.
    """
    ks = jax.random.split(key, 4)

    def unif(k, shape, fan_in):
        bound = 1.0 / np.sqrt(fan_in)
        return jax.random.uniform(k, shape, jnp.float32, -bound, bound)

    w_bead = unif(ks[0], (bead_embed_dim, time_embed_dim), bead_embed_dim).astype(jnp.bfloat16)
    b_bead = unif(ks[1], (1, time_embed_dim), bead_embed_dim)
    w_ada = unif(ks[2], (6, time_embed_dim, embed_dim), time_embed_dim).astype(jnp.bfloat16)
    b_ada = unif(ks[3], (6, 1, embed_dim), time_embed_dim)
    return dict(w_bead=w_bead, b_bead=b_bead, w_ada=w_ada, b_ada=b_ada)


def reference_adanorm(a, t, p):
    """Pure-JAX (f32) reference mirroring the PyTorch forward (mode='adanorm')."""
    w_bead = p["w_bead"].astype(jnp.float32)
    c = a @ w_bead + p["b_bead"][0] + t
    s = jax.nn.silu(c)
    w_ada = p["w_ada"].astype(jnp.float32)                      # (6, T, D)
    outs = jnp.einsum("bst,ktd->kbsd", s, w_ada) + p["b_ada"][:, None]
    return {name: outs[i] for i, name in enumerate(_OUT_NAMES)}


if __name__ == "__main__":
    # Small, lane-aligned demo shapes (module defaults are 256/256/256).
    # N = B*S = 256 rows, row_block=128 -> grid of 2, so both the MXU-shaped tile path and
    # the multi-step (megacore-shardable) grid are exercised. embed_dim=128 keeps every
    # output store lane-dense even at this reduced size.
    B, S = 2, 128
    bead_embed_dim, time_embed_dim, embed_dim = 64, 128, 128

    key = jax.random.PRNGKey(0)
    ka, kt, kp = jax.random.split(key, 3)
    a = jax.random.normal(ka, (B, S, bead_embed_dim), jnp.float32)
    t = jax.random.normal(kt, (B, S, time_embed_dim), jnp.float32)
    params = init_params(kp, bead_embed_dim, time_embed_dim, embed_dim)

    out = conditional_injection_adanorm(a, t, params, row_block=128)
    out = jax.block_until_ready(out)

    ref = reference_adanorm(a, t, params)
    for name in _OUT_NAMES:
        np.testing.assert_allclose(
            np.asarray(out[name]), np.asarray(ref[name]), rtol=2e-2, atol=2e-2
        )

    print("KERNEL_OK")
</pallas_src>

<mosaic_0001>
module attributes {stable_mosaic.version = 11 : i64} {
  func.func @cond_injection_kernel(%arg0: i32, %arg1: memref<128x64xf32, #tpu.memory_space<vmem>>, %arg2: memref<128x128xf32, #tpu.memory_space<vmem>>, %arg3: memref<64x128xbf16, #tpu.memory_space<vmem>>, %arg4: memref<1x128xf32, #tpu.memory_space<vmem>>, %arg5: memref<6x128x128xbf16, #tpu.memory_space<vmem>>, %arg6: memref<6x1x128xf32, #tpu.memory_space<vmem>>, %arg7: memref<6x128x128xf32, #tpu.memory_space<vmem>>) attributes {dimension_semantics = [#tpu.dimension_semantics<parallel>], iteration_bounds = array<i64: 2>, scalar_prefetch = 0 : i64, scratch_operands = 0 : i64, tpu.core_type = #tpu.core_type<tc>, window_params = [{transform_indices = @transform_0, window_bounds = array<i64: 128, 64>}, {transform_indices = @transform_1, window_bounds = array<i64: 128, 128>}, {pipeline_mode = #tpu.pipeline_mode<synchronous>, transform_indices = @transform_2, window_bounds = array<i64: 64, 128>}, {pipeline_mode = #tpu.pipeline_mode<synchronous>, transform_indices = @transform_3, window_bounds = array<i64: 1, 128>}, {pipeline_mode = #tpu.pipeline_mode<synchronous>, transform_indices = @transform_4, window_bounds = array<i64: 6, 128, 128>}, {pipeline_mode = #tpu.pipeline_mode<synchronous>, transform_indices = @transform_5, window_bounds = array<i64: 6, 1, 128>}, {transform_indices = @transform_6, window_bounds = array<i64: 6, 128, 128>}]} {
    %c0 = arith.constant 0 : index
    %c0_0 = arith.constant 0 : index
    %0 = vector.load %arg1[%c0, %c0_0] : memref<128x64xf32, #tpu.memory_space<vmem>>, vector<128x64xf32>
    %1 = arith.truncf %0 : vector<128x64xf32> to vector<128x64xbf16>
    %c0_1 = arith.constant 0 : index
    %c0_2 = arith.constant 0 : index
    %2 = vector.load %arg3[%c0_1, %c0_2] : memref<64x128xbf16, #tpu.memory_space<vmem>>, vector<64x128xbf16>
    %cst = arith.constant dense<0.000000e+00> : vector<128x128xf32>
    %3 = tpu.matmul %1, %2, %cst {dimension_numbers = #tpu.dot_dimension_numbers<[1], [0], [0], [1], [0, 0, 1, 1], [], []>} : vector<128x64xbf16>, vector<64x128xbf16>, vector<128x128xf32> -> vector<128x128xf32>
    %c0_3 = arith.constant 0 : index
    %c0_4 = arith.constant 0 : index
    %4 = vector.load %arg4[%c0_3, %c0_4] : memref<1x128xf32, #tpu.memory_space<vmem>>, vector<1x128xf32>
    %5 = vector.broadcast %4 : vector<1x128xf32> to vector<128x128xf32>
    %6 = arith.addf %3, %5 : vector<128x128xf32>
    %c0_5 = arith.constant 0 : index
    %c0_6 = arith.constant 0 : index
    %7 = vector.load %arg2[%c0_5, %c0_6] : memref<128x128xf32, #tpu.memory_space<vmem>>, vector<128x128xf32>
    %8 = arith.addf %6, %7 : vector<128x128xf32>
    %cst_7 = arith.constant 0.000000e+00 : f32
    %9 = vector.broadcast %cst_7 : f32 to vector<128x128xf32>
    %10 = arith.subf %9, %8 : vector<128x128xf32>
    %11 = math.exp %10 : vector<128x128xf32>
    %cst_8 = arith.constant 1.000000e+00 : f32
    %12 = vector.broadcast %cst_8 : f32 to vector<128x128xf32>
    %13 = arith.addf %12, %11 : vector<128x128xf32>
    %14 = tpu.reciprocal %13 {approx = true} : vector<128x128xf32> -> vector<128x128xf32>
    %15 = arith.mulf %8, %14 : vector<128x128xf32>
    %16 = arith.truncf %15 : vector<128x128xf32> to vector<128x128xbf16>
    %c0_9 = arith.constant 0 : index
    %c0_10 = arith.constant 0 : index
    %c0_11 = arith.constant 0 : index
    %17 = vector.load %arg5[%c0_9, %c0_10, %c0_11] : memref<6x128x128xbf16, #tpu.memory_space<vmem>>, vector<1x128x128xbf16>
    %18 = vector.shape_cast %17 : vector<1x128x128xbf16> to vector<128x128xbf16>
    %cst_12 = arith.constant dense<0.000000e+00> : vector<128x128xf32>
    %19 = tpu.matmul %16, %18, %cst_12 {dimension_numbers = #tpu.dot_dimension_numbers<[1], [0], [0], [1], [0, 0, 1, 1], [], []>} : vector<128x128xbf16>, vector<128x128xbf16>, vector<128x128xf32> -> vector<128x128xf32>
    %c0_13 = arith.constant 0 : index
    %c0_14 = arith.constant 0 : index
    %c0_15 = arith.constant 0 : index
    %20 = vector.load %arg6[%c0_13, %c0_14, %c0_15] : memref<6x1x128xf32, #tpu.memory_space<vmem>>, vector<1x1x128xf32>
    %21 = vector.shape_cast %20 : vector<1x1x128xf32> to vector<1x128xf32>
    %22 = vector.broadcast %21 : vector<1x128xf32> to vector<128x128xf32>
    %23 = arith.addf %19, %22 : vector<128x128xf32>
    %c0_16 = arith.constant 0 : index
    %c0_17 = arith.constant 0 : index
    %c0_18 = arith.constant 0 : index
    %24 = vector.load %arg7[%c0_16, %c0_17, %c0_18] : memref<6x128x128xf32, #tpu.memory_space<vmem>>, vector<1x128x128xf32>
    %25 = vector.shape_cast %24 : vector<1x128x128xf32> to vector<128x128xf32>
    %26 = vector.shape_cast %23 : vector<128x128xf32> to vector<1x128x128xf32>
    tpu.vector_store %arg7[%c0_16, %c0_17, %c0_18], %26 {strides = array<i32>} : memref<6x128x128xf32, #tpu.memory_space<vmem>>, vector<1x128x128xf32>,
    %c1 = arith.constant 1 : index
    %c0_19 = arith.constant 0 : index
    %c0_20 = arith.constant 0 : index
    %27 = vector.load %arg5[%c1, %c0_19, %c0_20] : memref<6x128x128xbf16, #tpu.memory_space<vmem>>, vector<1x128x128xbf16>
    %28 = vector.shape_cast %27 : vector<1x128x128xbf16> to vector<128x128xbf16>
    %cst_21 = arith.constant dense<0.000000e+00> : vector<128x128xf32>
    %29 = tpu.matmul %16, %28, %cst_21 {dimension_numbers = #tpu.dot_dimension_numbers<[1], [0], [0], [1], [0, 0, 1, 1], [], []>} : vector<128x128xbf16>, vector<128x128xbf16>, vector<128x128xf32> -> vector<128x128xf32>
    %c1_22 = arith.constant 1 : index
    %c0_23 = arith.constant 0 : index
    %c0_24 = arith.constant 0 : index
    %30 = vector.load %arg6[%c1_22, %c0_23, %c0_24] : memref<6x1x128xf32, #tpu.memory_space<vmem>>, vector<1x1x128xf32>
    %31 = vector.shape_cast %30 : vector<1x1x128xf32> to vector<1x128xf32>
    %32 = vector.broadcast %31 : vector<1x128xf32> to vector<128x128xf32>
    %33 = arith.addf %29, %32 : vector<128x128xf32>
    %c1_25 = arith.constant 1 : index
    %c0_26 = arith.constant 0 : index
    %c0_27 = arith.constant 0 : index
    %34 = vector.load %arg7[%c1_25, %c0_26, %c0_27] : memref<6x128x128xf32, #tpu.memory_space<vmem>>, vector<1x128x128xf32>
    %35 = vector.shape_cast %34 : vector<1x128x128xf32> to vector<128x128xf32>
    %36 = vector.shape_cast %33 : vector<128x128xf32> to vector<1x128x128xf32>
    tpu.vector_store %arg7[%c1_25, %c0_26, %c0_27], %36 {strides = array<i32>} : memref<6x128x128xf32, #tpu.memory_space<vmem>>, vector<1x128x128xf32>,
    %c2 = arith.constant 2 : index
    %c0_28 = arith.constant 0 : index
    %c0_29 = arith.constant 0 : index
    %37 = vector.load %arg5[%c2, %c0_28, %c0_29] : memref<6x128x128xbf16, #tpu.memory_space<vmem>>, vector<1x128x128xbf16>
    %38 = vector.shape_cast %37 : vector<1x128x128xbf16> to vector<128x128xbf16>
    %cst_30 = arith.constant dense<0.000000e+00> : vector<128x128xf32>
    %39 = tpu.matmul %16, %38, %cst_30 {dimension_numbers = #tpu.dot_dimension_numbers<[1], [0], [0], [1], [0, 0, 1, 1], [], []>} : vector<128x128xbf16>, vector<128x128xbf16>, vector<128x128xf32> -> vector<128x128xf32>
    %c2_31 = arith.constant 2 : index
    %c0_32 = arith.constant 0 : index
    %c0_33 = arith.constant 0 : index
    %40 = vector.load %arg6[%c2_31, %c0_32, %c0_33] : memref<6x1x128xf32, #tpu.memory_space<vmem>>, vector<1x1x128xf32>
    %41 = vector.shape_cast %40 : vector<1x1x128xf32> to vector<1x128xf32>
    %42 = vector.broadcast %41 : vector<1x128xf32> to vector<128x128xf32>
    %43 = arith.addf %39, %42 : vector<128x128xf32>
    %c2_34 = arith.constant 2 : index
    %c0_35 = arith.constant 0 : index
    %c0_36 = arith.constant 0 : index
    %44 = vector.load %arg7[%c2_34, %c0_35, %c0_36] : memref<6x128x128xf32, #tpu.memory_space<vmem>>, vector<1x128x128xf32>
    %45 = vector.shape_cast %44 : vector<1x128x128xf32> to vector<128x128xf32>
    %46 = vector.shape_cast %43 : vector<128x128xf32> to vector<1x128x128xf32>
    tpu.vector_store %arg7[%c2_34, %c0_35, %c0_36], %46 {strides = array<i32>} : memref<6x128x128xf32, #tpu.memory_space<vmem>>, vector<1x128x128xf32>,
    %c3 = arith.constant 3 : index
    %c0_37 = arith.constant 0 : index
    %c0_38 = arith.constant 0 : index
    %47 = vector.load %arg5[%c3, %c0_37, %c0_38] : memref<6x128x128xbf16, #tpu.memory_space<vmem>>, vector<1x128x128xbf16>
    %48 = vector.shape_cast %47 : vector<1x128x128xbf16> to vector<128x128xbf16>
    %cst_39 = arith.constant dense<0.000000e+00> : vector<128x128xf32>
    %49 = tpu.matmul %16, %48, %cst_39 {dimension_numbers = #tpu.dot_dimension_numbers<[1], [0], [0], [1], [0, 0, 1, 1], [], []>} : vector<128x128xbf16>, vector<128x128xbf16>, vector<128x128xf32> -> vector<128x128xf32>
    %c3_40 = arith.constant 3 : index
    %c0_41 = arith.constant 0 : index
    %c0_42 = arith.constant 0 : index
    %50 = vector.load %arg6[%c3_40, %c0_41, %c0_42] : memref<6x1x128xf32, #tpu.memory_space<vmem>>, vector<1x1x128xf32>
    %51 = vector.shape_cast %50 : vector<1x1x128xf32> to vector<1x128xf32>
    %52 = vector.broadcast %51 : vector<1x128xf32> to vector<128x128xf32>
    %53 = arith.addf %49, %52 : vector<128x128xf32>
    %c3_43 = arith.constant 3 : index
    %c0_44 = arith.constant 0 : index
    %c0_45 = arith.constant 0 : index
    %54 = vector.load %arg7[%c3_43, %c0_44, %c0_45] : memref<6x128x128xf32, #tpu.memory_space<vmem>>, vector<1x128x128xf32>
    %55 = vector.shape_cast %54 : vector<1x128x128xf32> to vector<128x128xf32>
    %56 = vector.shape_cast %53 : vector<128x128xf32> to vector<1x128x128xf32>
    tpu.vector_store %arg7[%c3_43, %c0_44, %c0_45], %56 {strides = array<i32>} : memref<6x128x128xf32, #tpu.memory_space<vmem>>, vector<1x128x128xf32>,
    %c4 = arith.constant 4 : index
    %c0_46 = arith.constant 0 : index
    %c0_47 = arith.constant 0 : index
    %57 = vector.load %arg5[%c4, %c0_46, %c0_47] : memref<6x128x128xbf16, #tpu.memory_space<vmem>>, vector<1x128x128xbf16>
    %58 = vector.shape_cast %57 : vector<1x128x128xbf16> to vector<128x128xbf16>
    %cst_48 = arith.constant dense<0.000000e+00> : vector<128x128xf32>
    %59 = tpu.matmul %16, %58, %cst_48 {dimension_numbers = #tpu.dot_dimension_numbers<[1], [0], [0], [1], [0, 0, 1, 1], [], []>} : vector<128x128xbf16>, vector<128x128xbf16>, vector<128x128xf32> -> vector<128x128xf32>
    %c4_49 = arith.constant 4 : index
    %c0_50 = arith.constant 0 : index
    %c0_51 = arith.constant 0 : index
    %60 = vector.load %arg6[%c4_49, %c0_50, %c0_51] : memref<6x1x128xf32, #tpu.memory_space<vmem>>, vector<1x1x128xf32>
    %61 = vector.shape_cast %60 : vector<1x1x128xf32> to vector<1x128xf32>
    %62 = vector.broadcast %61 : vector<1x128xf32> to vector<128x128xf32>
    %63 = arith.addf %59, %62 : vector<128x128xf32>
    %c4_52 = arith.constant 4 : index
    %c0_53 = arith.constant 0 : index
    %c0_54 = arith.constant 0 : index
    %64 = vector.load %arg7[%c4_52, %c0_53, %c0_54] : memref<6x128x128xf32, #tpu.memory_space<vmem>>, vector<1x128x128xf32>
    %65 = vector.shape_cast %64 : vector<1x128x128xf32> to vector<128x128xf32>
    %66 = vector.shape_cast %63 : vector<128x128xf32> to vector<1x128x128xf32>
    tpu.vector_store %arg7[%c4_52, %c0_53, %c0_54], %66 {strides = array<i32>} : memref<6x128x128xf32, #tpu.memory_space<vmem>>, vector<1x128x128xf32>,
    %c5 = arith.constant 5 : index
    %c0_55 = arith.constant 0 : index
    %c0_56 = arith.constant 0 : index
    %67 = vector.load %arg5[%c5, %c0_55, %c0_56] : memref<6x128x128xbf16, #tpu.memory_space<vmem>>, vector<1x128x128xbf16>
    %68 = vector.shape_cast %67 : vector<1x128x128xbf16> to vector<128x128xbf16>
    %cst_57 = arith.constant dense<0.000000e+00> : vector<128x128xf32>
    %69 = tpu.matmul %16, %68, %cst_57 {dimension_numbers = #tpu.dot_dimension_numbers<[1], [0], [0], [1], [0, 0, 1, 1], [], []>} : vector<128x128xbf16>, vector<128x128xbf16>, vector<128x128xf32> -> vector<128x128xf32>
    %c5_58 = arith.constant 5 : index
    %c0_59 = arith.constant 0 : index
    %c0_60 = arith.constant 0 : index
    %70 = vector.load %arg6[%c5_58, %c0_59, %c0_60] : memref<6x1x128xf32, #tpu.memory_space<vmem>>, vector<1x1x128xf32>
    %71 = vector.shape_cast %70 : vector<1x1x128xf32> to vector<1x128xf32>
    %72 = vector.broadcast %71 : vector<1x128xf32> to vector<128x128xf32>
    %73 = arith.addf %69, %72 : vector<128x128xf32>
    %c5_61 = arith.constant 5 : index
    %c0_62 = arith.constant 0 : index
    %c0_63 = arith.constant 0 : index
    %74 = vector.load %arg7[%c5_61, %c0_62, %c0_63] : memref<6x128x128xf32, #tpu.memory_space<vmem>>, vector<1x128x128xf32>
    %75 = vector.shape_cast %74 : vector<1x128x128xf32> to vector<128x128xf32>
    %76 = vector.shape_cast %73 : vector<128x128xf32> to vector<1x128x128xf32>
    tpu.vector_store %arg7[%c5_61, %c0_62, %c0_63], %76 {strides = array<i32>} : memref<6x128x128xf32, #tpu.memory_space<vmem>>, vector<1x128x128xf32>,
    return
  }
  func.func @transform_0(%arg0: i32) -> (i32, i32) {
    %c0_i32 = arith.constant 0 : i32
    %c0_i32_0 = arith.constant 0 : i32
    return %arg0, %c0_i32 : i32, i32
  }
  func.func @transform_1(%arg0: i32) -> (i32, i32) {
    %c0_i32 = arith.constant 0 : i32
    %c0_i32_0 = arith.constant 0 : i32
    return %arg0, %c0_i32 : i32, i32
  }
  func.func @transform_2(%arg0: i32) -> (i32, i32) {
    %c0_i32 = arith.constant 0 : i32
    %c0_i32_0 = arith.constant 0 : i32
    %c0_i32_1 = arith.constant 0 : i32
    return %c0_i32, %c0_i32_0 : i32, i32
  }
  func.func @transform_3(%arg0: i32) -> (i32, i32) {
    %c0_i32 = arith.constant 0 : i32
    %c0_i32_0 = arith.constant 0 : i32
    %c0_i32_1 = arith.constant 0 : i32
    return %c0_i32, %c0_i32_0 : i32, i32
  }
  func.func @transform_4(%arg0: i32) -> (i32, i32, i32) {
    %c0_i32 = arith.constant 0 : i32
    %c0_i32_0 = arith.constant 0 : i32
    %c0_i32_1 = arith.constant 0 : i32
    %c0_i32_2 = arith.constant 0 : i32
    return %c0_i32, %c0_i32_0, %c0_i32_1 : i32, i32, i32
  }
  func.func @transform_5(%arg0: i32) -> (i32, i32, i32) {
    %c0_i32 = arith.constant 0 : i32
    %c0_i32_0 = arith.constant 0 : i32
    %c0_i32_1 = arith.constant 0 : i32
    %c0_i32_2 = arith.constant 0 : i32
    return %c0_i32, %c0_i32_0, %c0_i32_1 : i32, i32, i32
  }
  func.func @transform_6(%arg0: i32) -> (i32, i32, i32) {
    %c0_i32 = arith.constant 0 : i32
    %c0_i32_0 = arith.constant 0 : i32
    %c0_i32_1 = arith.constant 0 : i32
    return %c0_i32, %arg0, %c0_i32_0 : i32, i32, i32
  }
}

</mosaic_0001>

<bundles_post_ra>
// kernel: tpu_custom_call.1
= control target key start
LH: loop header
LB: loop body
LE: loop exit
PB: predicated region body
PF: predicated region fallthrough
CT: control target
= control target key end

     0   :  { %11 = vsyncpa [#allocation3], 0  ;;  %s3594_s0 = inlined_call_operand.vmem [shape: f32[256,64], index: 0, kind: input, shape index: {}]   ;;  %s3595_s1 = inlined_call_operand.hbm [shape: f32[256,128], index: 1, kind: input, shape index: {}]   ;;  %s3596_s2 = inlined_call_operand.hbm [shape: bf16[64,128], index: 2, kind: input, shape index: {}]   ;;  %s3597_s3 = inlined_call_operand.vmem [shape: f32[1,128], index: 3, kind: input, shape index: {}]   ;;  %s3598_s4 = inlined_call_operand.vmem [shape: bf16[6,128,128], index: 4, kind: input, shape index: {}]   ;;  %s3599_s5 = inlined_call_operand.vmem [shape: f32[6,1,128], index: 5, kind: input, shape index: {}]   ;;  %s3600_s6 = inlined_call_operand.hbm [shape: f32[6,256,128], index: 6, kind: output, shape index: {}]  }
   0x1   :  { %13 = vsyncpa [#allocation3 + $0x1], 0 }
   0x2   :  { %14 = vsyncpa [#allocation6], 0 }
   0x3   :  { %15 = vsyncpa [#allocation4], 0 }
   0x4   :  { %17 = vsyncpa [#allocation4 + $0x1], 0  ;;  %s2819_s21 = smov 0   ;;  %s2821_s22 = smov 0  }
   0x5   :  { %s2823_s23 = smov 0   ;;  %s2825_s24 = smov 0  }
   0x6 LB: > { %s2840_s25 = sadd.s32 4294967295, %s2769_s24   ;;  %s1888_s26 = sadd.s32 4294967294, %s2769_s24   ;;  %s2769_s24 = sphi %s2825_s24, %s3620_s24   ;;  %s2765_s23 = sphi %s2823_s23, %s3619_s23   ;;  %s2761_s22 = sphi %s2821_s22, %s3618_s22   ;;  %s2757_s21 = sphi %s2819_s21, %s3617_s21  }
   0x7   : > { %p69_p0 = scmp.ne.s32.totalorder %s2761_s22, %s2757_s21  ;;  %p3601_p1 = scmp.eq.s32.totalorder %s2840_s25, 0 }
   0x8   : > { %p183_p3 = scmp.eq.s32.totalorder %s1888_s26, 1  ;;  %p1889_p5 = scmp.ge.s32.totalorder %s2769_s24, 1 }
   0x9   : > { %p2849_p4 = por %p3601_p1, %p69_p0  ;;  %p190_p7 = scmp.lt.s32.totalorder %s2769_s24, 3 }
   0xa   : > { %p2854_p6 = por %p183_p3, %p69_p0  ;;  %s2771_s30 = smov [#allocation5]  }
   0xb   : > { %s3604_s27 = scalar_select %p2849_p4, 1, 0 }
   0xc   : > { %s3605_s28 = scalar_select %p2854_p6, 1, 0 }
   0xd   : > { %p2859_p8 = pnand %p1889_p5, %p190_p7  ;;  %s202_s7 = sshll.u32 %s2771_s30, 4  ;;  %s2863_s7 = int_to_ptr.vmem [resolvable:$true] %s202_s7 }
   0xe   : > { %s2875_s9 = sadd.s32 1, %s2769_s24   ;;  %s56_s10 = sadd.s32 1, %s2765_s23 }
   0xf   : > { %s3606_s29 = scalar_select %p2859_p8, 1, 0 }
  0x10   : > { %p2493_p9 = pneg %p2859_p8  ;;  %s53_s11 = ssub.s32 %s2769_s24, %s2875_s9 }
  0x11   : > { %s2669_s14 = scalar_lea.hbm %s3596_s2, 512 }
  0x12   : > { %p2870_p11 = pnand %p2493_p9, %p3601_p1  ;;  %p2670_p12 = scmp.ne.s32.totalorder %s3596_s2, %s2669_s14 }
  0x13   : > { %p2676_p5 = scmp.lt.u32.totalorder %s2669_s14, %s3596_s2 }
  0x14   : > { %p2671_p13 = pneg %p2870_p11 }
  0x16   : > { %p2672_p0 = pnand %p2671_p13, %p2670_p12 }
  0x18   : > { %p2673_p3 = pneg %p2672_p0 }
  0x1a   : > { %p2678_p7 = pnand %p2676_p5, %p2673_p3 }
  0x1c   : > { %2681 = shalt.err (!%p2678_p7)
}
  0x1d   : > { %s2682_s19 = scalar_lea.vmem %s2863_s7, 512  ;;  %p2690_p2 = scmp.lt.s32.totalorder %s2863_s7, %s2863_s7 }
  0x1e   : > { %p2683_p9 = scmp.ne.s32.totalorder %s2863_s7, %s2682_s19  ;;  %p2691_p6 = scmp.lt.s32.totalorder %s2682_s19, %s2682_s19 }
  0x20   : > { %p2685_p10 = pnand %p2683_p9, %p2671_p13  ;;  %p2692_p4 = por %p2691_p6, %p2690_p2 }
  0x22   : > { %p2686_p1 = pneg %p2685_p10 }
  0x24   : > { %p2693_p8 = pnand %p2692_p4, %p2686_p1 }
  0x26   : > { %2696 = shalt.err (!%p2693_p8)
}
  0x27   : > { %s2772_s20 = smov 64   ;;  %s2773_s26 = smov 4  }
  0x28   : > { %2496 = dma.hbm_to_vmem [thread:$0]  (!%p2870_p11), %s3596_s2, 512, %s2863_s7, [#allocation6], %s2772_s20, %s2772_s20, %s2773_s26  }
  0x29   : > { %p54_p2 = scmp.eq.s32.totalorder %s53_s11, 0  ;;  %p63_p1 = scmp.ne.s32.totalorder %s2765_s23, %s2761_s22 }
  0x2a   : > { %p64_p4 = scmp.eq.s32.totalorder %s2769_s24, 0  ;;  %p2506_p6 = scmp.lt.s32.totalorder %s2769_s24, 2 }
  0x2b   : > { %s2906_s13 = scalar_select %p54_p2, %s2765_s23, %s56_s10  }
  0x2c   : > { %p65_p8 = por %p64_p4, %p63_p1  ;;  %p3608_p10 = scmp.eq.s32.totalorder %s2840_s25, 1 }
  0x2d   : > { %s234_s15 = sand.u32 1, %s2765_s23   ;;  %s2136_s16 = sshll.u32 %s2769_s24, 11 }
  0x2e   : > { %p2910_p12 = por %p3608_p10, %p63_p1  ;;  %s1892_s17 = sshll.u32 %s234_s15, 7 }
  0x2f   : > { %s2919_s19 = scalar_lea.hbm %s3595_s1, %s2136_s16  ;;  %s238_s7 = scalar_lea.vmem [#allocation2], %s1892_s17 }
  0x30   : > { %s245_s10 = sshll.u32 %s238_s7, 4  ;;  %p2921_p11 = pnand %p2506_p6, %p65_p8  ;;  %s2925_s10 = int_to_ptr.vmem [resolvable:$true] %s245_s10 }
  0x31   : > { %s2927_s20 = scalar_lea.sflag [#allocation3], %s234_s15  ;;  %s2697_s26 = scalar_lea.hbm %s2919_s19, 2048 }
  0x32   : > { %p2698_p13 = scmp.ne.s32.totalorder %s2919_s19, %s2697_s26  ;;  %p2699_p0 = pneg %p2921_p11 }
  0x33   : > { %s2702_s16 = scalar_lea.hbm %s3595_s1, 4096  ;;  %p2703_p7 = scmp.lt.u32.totalorder %s2919_s19, %s3595_s1 }
  0x34   : > { %p2700_p3 = pnand %p2699_p0, %p2698_p13  ;;  %p2704_p9 = scmp.lt.u32.totalorder %s2702_s16, %s2697_s26 }
  0x35   : > { %p2706_p1 = scmp.lt.u32.totalorder %s2697_s26, %s2919_s19 }
  0x36   : > { %p2701_p5 = pneg %p2700_p3  ;;  %p2705_p2 = por %p2704_p9, %p2703_p7 }
  0x38   : > { %p2707_p4 = por %p2706_p1, %p2705_p2 }
  0x3a   : > { %p2708_p6 = pnand %p2707_p4, %p2701_p5 }
  0x3c   : > { %2711 = shalt.err (!%p2708_p6)
}
  0x3d   : > { %s2712_s15 = scalar_lea.vmem %s2925_s10, 2048  ;;  %s2774_s18 = smov [#allocation2]  }
  0x3e   : > { %p2713_p8 = scmp.ne.s32.totalorder %s2925_s10, %s2712_s15  ;;  %s2717_s7 = sshll.u32 %s2774_s18, 4  ;;  %s2718_s7 = int_to_ptr.vmem [resolvable:$false] %s2717_s7 }
  0x3f   : > { %s2719_s30 = scalar_lea.vmem %s2718_s7, 4096  ;;  %p2720_p3 = scmp.lt.s32.totalorder %s2925_s10, %s2718_s7 }
  0x40   : > { %p2715_p10 = pnand %p2713_p8, %p2699_p0  ;;  %p2721_p7 = scmp.lt.s32.totalorder %s2719_s30, %s2712_s15 }
  0x42   : > { %p2716_p13 = pneg %p2715_p10  ;;  %p2722_p9 = por %p2721_p7, %p2720_p3 }
  0x44   : > { %p2723_p2 = pnand %p2722_p9, %p2716_p13 }
  0x46   : > { %2726 = shalt.err (!%p2723_p2)
}
  0x47   : > { %s2775_s26 = smov 128   ;;  %s2776_s12 = smov 8  }
  0x48   : > { %2500 = dma.hbm_to_vmem [thread:$0]  (!%p2921_p11), %s2919_s19, 2048, %s2925_s10, %s2927_s20, %s2775_s26, %s2775_s26, %s2776_s12  }
  0x49   : > { %p3611_p0 = scmp.ne.s32.totalorder %s3606_s29, 0 }
  0x4a   : > { %s2958_s16 = sand.u32 (!%p3611_p0), 1, %s2761_s22   ;;  %p3612_p5 = scmp.ne.s32.totalorder (!%p3611_p0), %s3604_s27, 0 }
  0x4b   : > { %257 = sbr.rel (%p3611_p0) target bundleno = 679 (0x2a7), region = 44  ;;  %s1896_s17 = sshll.u32 (!%p3611_p0), %s2958_s16, 7 }
  0x4c   : > { %s260_s8 = scalar_lea.sflag (!%p3611_p0), [#allocation3], %s2958_s16  ;;  %s2962_s15 = scalar_lea.vmem (!%p3611_p0), [#allocation2], %s1896_s17 }
  0x52   : > { %2744 = dma.done.wait (%p3612_p5), %s260_s8, 2048  }
  0x53   : > { %2746 = vsyncadd (%p3612_p5), %s260_s8, 4294965248  ;;  %p3613_p11 = scmp.eq.s32.totalorder %s2840_s25, 0 }
  0x55   : > { %2748 = dma.done.wait (%p3613_p11), [#allocation6], 512   ;;  %p3614_p1 = pmov %p3613_p11 }
  0x56   : > { %s1898_s29 = sshll.u32 %s2840_s25, 4  ;;  %v2553_v0 = vld [vmem:[#allocation5] sm:$0xff]   ;;  %v2554_v1 = vld [vmem:[#allocation5 + $0x8] sm:$0xff]   ;;  %v2555_v2 = vld [vmem:[#allocation5 + $0x10] sm:$0xff]   ;;  %vm373_vm0 = vcmask 523264   ;;  %s2478_s7 = smul.u32 768, %s2958_s16 }
  0x57   : > { %2750 = vsyncadd (%p3614_p1), [#allocation6], 4294966784  ;;  %p302_p4 = scmp.lt.s32.totalorder %s1898_s29, 31  ;;  %2246 = vmatprep.subr.bf16.mxu0 %v2553_v0  ;;  %v2556_v6 = vld [vmem:[#allocation5 + $0x18] sm:$0xff]   ;;  %v2557_v28 = vld [vmem:[%s3598_s4] sm:$0xff]  }
  0x58   : > { %2247 = vmatpush3.bf16.msra.mxu0 %v2553_v0  ;;  %v2558_v29 = vld [vmem:[%s3598_s4 + $0x40] sm:$0xff]   ;;  %2270 = vmatprep.subr.bf16.mxu1 %v2557_v28  ;;  %v2559_v30 = vld [vmem:[%s3598_s4 + $0x8] sm:$0xff]   ;;  %v2561_v32 = vld [vmem:[%s3598_s4 + $0x10] sm:$0xff]   ;;  %s3346_s8 = scalar_lea.vmem [#allocation7], %s2478_s7  ;;  %s1751_s7 = scalar_lea.sflag [#allocation4], %s2958_s16 }
  0x59   : > { %s3622_s29 = smov (!%p302_p4, %s1898_s29), 31  ;;  %2248 = vmatprep.subr.bf16.mxu0 %v2554_v1  ;;  %2271 = vmatpush3.bf16.msra.mxu1 %v2557_v28  ;;  %v2560_v31 = vld [vmem:[%s3598_s4 + $0x48] sm:$0xff]   ;;  %v2562_v33 = vld [vmem:[%s3598_s4 + $0x50] sm:$0xff]   ;;  %v2563_v34 = vld [vmem:[%s3598_s4 + $0x18] sm:$0xff]  }
  0x5a   : > { %s1899_s19 = sshll.u32 %s3622_s29, 3  ;;  %2272 = vmatprep.subr.bf16.mxu1 %v2559_v30  ;;  %v2564_v35 = vld [vmem:[%s3598_s4 + $0x58] sm:$0xff]   ;;  %v2565_v36 = vld [vmem:[%s3598_s4 + $0x20] sm:$0xff]   ;;  %v2567_v38 = vld [vmem:[%s3598_s4 + $0x28] sm:$0xff]  }
  0x5b   : > { %s2976_s20 = scalar_lea.vmem %s3594_s0, %s1899_s19  ;;  %v2566_v37 = vld [vmem:[%s3598_s4 + $0x60] sm:$0xff]   ;;  %v2568_v39 = vld [vmem:[%s3598_s4 + $0x68] sm:$0xff]   ;;  %v2569_v40 = vld [vmem:[%s3598_s4 + $0x30] sm:$0xff]  }
  0x5c   : > { %v310_v3 = vld [vmem:[%s2976_s20] sm:$0xff]  ;;  %v311_v4 = vld [vmem:[%s2976_s20 + $0x8] sm:$0xff]  ;;  %2249 = vmatpush3.bf16.msra.mxu0 %v2554_v1  ;;  %v312_v7 = vld [vmem:[%s2976_s20 + $0x10] sm:$0xff] }
  0x5d   : > { %v326_v5 = vpack.c.bf16 %v311_v4, %v310_v3  ;;  %2250 = vmatprep.subr.bf16.mxu0 %v2555_v2  ;;  %v313_v8 = vld [vmem:[%s2976_s20 + $0x18] sm:$0xff]  ;;  %v314_v9 = vld [vmem:[%s2976_s20 + $0x20] sm:$0xff]  ;;  %v315_v10 = vld [vmem:[%s2976_s20 + $0x28] sm:$0xff]  ;;  %2273 = vmatpush3.bf16.msra.mxu1 %v2559_v30 }
  0x5e   : > { %v327_v11 = vpack.c.bf16 %v313_v8, %v312_v7  ;;  %v328_v12 = vpack.c.bf16 %v315_v10, %v314_v9  ;;  %v316_v13 = vld [vmem:[%s2976_s20 + $0x30] sm:$0xff]  ;;  %v317_v14 = vld [vmem:[%s2976_s20 + $0x38] sm:$0xff]  ;;  %v318_v15 = vld [vmem:[%s2976_s20 + $0x40] sm:$0xff]  ;;  %2274 = vmatprep.subr.bf16.mxu1 %v2561_v32 }
  0x5f   : > { %2254 = vmatprep.mubr.msk.bf16.mxu0 %vm373_vm0, %v326_v5  ;;  %v319_v16 = vld [vmem:[%s2976_s20 + $0x48] sm:$0xff]  ;;  %v329_v17 = vpack.c.bf16 %v317_v14, %v316_v13  ;;  %v320_v19 = vld [vmem:[%s2976_s20 + $0x50] sm:$0xff]  ;;  %v321_v20 = vld [vmem:[%s2976_s20 + $0x58] sm:$0xff] }
  0x60   : > { %2251 = vmatpush3.bf16.msra.mxu0 %v2555_v2  ;;  %v330_v18 = vpack.c.bf16 %v319_v16, %v318_v15  ;;  %v322_v21 = vld [vmem:[%s2976_s20 + $0x60] sm:$0xff]  ;;  %v323_v22 = vld [vmem:[%s2976_s20 + $0x68] sm:$0xff]  ;;  %v331_v23 = vpack.c.bf16 %v321_v20, %v320_v19  ;;  %v324_v25 = vld [vmem:[%s2976_s20 + $0x70] sm:$0xff] }
  0x61   : > { %2252 = vmatprep.subr.bf16.mxu0 %v2556_v6  ;;  %v332_v24 = vpack.c.bf16 %v323_v22, %v322_v21  ;;  %v325_v26 = vld [vmem:[%s2976_s20 + $0x78] sm:$0xff]  ;;  %2275 = vmatpush3.bf16.msra.mxu1 %v2561_v32  ;;  %v2570_v41 = vld [vmem:[%s3598_s4 + $0x70] sm:$0xff]   ;;  %v3053_v44 = vld [vmem:[%s3598_s4 + $0x80] sm:$0xff]  }
  0x62   : > { %v333_v27 = vpack.c.bf16 %v325_v26, %v324_v25  ;;  %2276 = vmatprep.subr.bf16.mxu1 %v2563_v34  ;;  %v2571_v42 = vld [vmem:[%s3598_s4 + $0x38] sm:$0xff]   ;;  %v3058_v45 = vld [vmem:[%s3598_s4 + $0xc0] sm:$0xff]   ;;  %v497_v48 = vld [vmem:[%s2962_s15 + $0x10] sm:$0xff] }
  0x63   : > { %v2572_v43 = vld [vmem:[%s3598_s4 + $0x78] sm:$0xff]   ;;  %v3065_v46 = vld [vmem:[%s3597_s3] ss:$0 sm:$0xff]  ;;  %v496_v58 = vld [vmem:[%s2962_s15 + $0x8] sm:$0xff] }
  0x64   : > { %2253 = vmatpush3.bf16.msra.mxu0 %v2556_v6  ;;  %v495_v51 = vld [vmem:[%s2962_s15] sm:$0xff]  ;;  %v498_v54 = vld [vmem:[%s2962_s15 + $0x18] sm:$0xff]  ;;  %v501_v6 = vld [vmem:[%s2962_s15 + $0x30] sm:$0xff] }
  0x65   : > { %2302 = vmatprep.subr.bf16.mxu0 %v2558_v29  ;;  %2277 = vmatpush3.bf16.msra.mxu1 %v2563_v34  ;;  %v499_v10 = vld [vmem:[%s2962_s15 + $0x20] sm:$0xff]  ;;  %v502_v14 = vld [vmem:[%s2962_s15 + $0x38] sm:$0xff]  ;;  %v505_v30 = vld [vmem:[%s2962_s15 + $0x50] sm:$0xff] }
  0x66   : > { %2278 = vmatprep.subr.bf16.mxu1 %v2565_v36  ;;  %v503_v34 = vld [vmem:[%s2962_s15 + $0x40] sm:$0xff] }
  0x67   : > { %2255 = vmatmul.mubr.msk.bf16.vlgmr.msra.gmra.mrb[0].mxu0 %vm373_vm0, %v327_v11 }
  0x68   : > { %2258 = vmatprep.mubr.msk.bf16.mxu0 %vm373_vm0, %v328_v12  ;;  %2303 = vmatpush3.bf16.msra.mxu0 %v2558_v29 }
  0x69   : > { %2304 = vmatprep.subr.bf16.mxu0 %v2560_v31  ;;  %2279 = vmatpush3.bf16.msra.mxu1 %v2565_v36 }
  0x6a   : > { %2280 = vmatprep.subr.bf16.mxu1 %v2567_v38 }
  0x6c   : > { %2305 = vmatpush3.bf16.msra.mxu0 %v2560_v31 }
  0x6d   : > { %2306 = vmatprep.subr.bf16.mxu0 %v2562_v33  ;;  %2281 = vmatpush3.bf16.msra.mxu1 %v2567_v38  ;;  %v506_v38 = vld [vmem:[%s2962_s15 + $0x58] sm:$0xff] }
  0x6e   : > { %2282 = vmatprep.subr.bf16.mxu1 %v2569_v40 }
  0x6f   : > { %2259 = vmatmul.mubr.msk.bf16.gmra.mrb[4].mxu0 %vm373_vm0, %v329_v17 }
  0x70   : > { %2262 = vmatprep.mubr.msk.bf16.mxu0 %vm373_vm0, %v330_v18  ;;  %2307 = vmatpush3.bf16.msra.mxu0 %v2562_v33  ;;  %v500_v18 = vld [vmem:[%s2962_s15 + $0x28] sm:$0xff] }
  0x71   : > { %2308 = vmatprep.subr.bf16.mxu0 %v2564_v35  ;;  %2283 = vmatpush3.bf16.msra.mxu1 %v2569_v40 }
  0x72   : > { %2284 = vmatprep.subr.bf16.mxu1 %v2571_v42 }
  0x74   : > { %2309 = vmatpush3.bf16.msra.mxu0 %v2564_v35 }
  0x75   : > { %2310 = vmatprep.subr.bf16.mxu0 %v2566_v37  ;;  %2285 = vmatpush3.bf16.msra.mxu1 %v2571_v42 }
  0x76   : > { %2334 = vmatprep.subr.bf16.mxu1 %v3053_v44 }
  0x77   : > { %2263 = vmatmul.mubr.msk.bf16.gmra.mrb[8].mxu0 %vm373_vm0, %v331_v23 }
  0x78   : > { %2266 = vmatprep.mubr.msk.bf16.mxu0 %vm373_vm0, %v332_v24  ;;  %2311 = vmatpush3.bf16.msra.mxu0 %v2566_v37 }
  0x79   : > { %2312 = vmatprep.subr.bf16.mxu0 %v2568_v39 }
  0x7c   : > { %2313 = vmatpush3.bf16.msra.mxu0 %v2568_v39 }
  0x7d   : > { %2314 = vmatprep.subr.bf16.mxu0 %v2570_v41 }
  0x7f   : > { %2267 = vmatmul.mubr.msk.bf16.gmra.mrb[12].mxu0 %vm373_vm0, %v333_v27 }
  0x80   : > { %2315 = vmatpush3.bf16.msra.mxu0 %v2570_v41 }
  0x81   : > { %2316 = vmatprep.subr.bf16.mxu0 %v2572_v43 }
  0x84   : > { %2317 = vmatpush3.bf16.msra.mxu0 %v2572_v43  ;;  %v504_v43 = vld [vmem:[%s2962_s15 + $0x48] sm:$0xff] }
  0x85   : > { %2366 = vmatprep.subr.bf16.mxu0 %v3058_v45 }
 0x13a   : > { %v2256_v47 = vpop.f32.mrb[0].mxu0 }
 0x13b   : > { %v441_v49 = vadd.f32 %v2256_v47, %v3065_v46  ;;  %v432_v50 = vpop.f32.mrb[1].mxu0 }
 0x13c   : > { %v433_v52 = vadd.f32 %v3065_v46, %v432_v50  ;;  %v2257_v53 = vpop.f32.mrb[2].mxu0 }
 0x13d   : > { %v3072_v55 = vadd.f32 %v497_v48, %v441_v49  ;;  %v444_v56 = vadd.f32 %v2257_v53, %v3065_v46  ;;  %v435_v57 = vpop.f32.mrb[3].mxu0 }
 0x13e   : > { %v3076_v59 = vadd.f32 %v495_v51, %v433_v52  ;;  %v436_v60 = vadd.f32 %v3065_v46, %v435_v57 }
 0x13f   : > { %v529_v61 = vsub.f32 0.0, %v3072_v55  ;;  %v3080_v62 = vadd.f32 %v498_v54, %v444_v56 }
 0x140   : > { %v527_v63 = vsub.f32 0.0, %v3076_v59  ;;  %v3083_v0 = vadd.f32 %v496_v58, %v436_v60 }
 0x141   : > { %v547_v1 = vmul.f32 1.442695, %v529_v61  ;;  %v530_v2 = vsub.f32 0.0, %v3080_v62 }
 0x142   : > { %v543_v3 = vmul.f32 1.442695, %v527_v63  ;;  %v528_v4 = vsub.f32 0.0, %v3083_v0  ;;  %v2260_v5 = vpop.f32.mrb[4].mxu0 }
 0x143   : > { %2605 = vpow2.f32 %v547_v1  ;;  %v549_v7 = vmul.f32 1.442695, %v530_v2  ;;  %v457_v8 = vadd.f32 %v2260_v5, %v3065_v46  ;;  %v448_v9 = vpop.f32.mrb[5].mxu0  ;;  %v509_v5 = vld [vmem:[%s2962_s15 + $0x70] sm:$0xff] }
 0x144   : > { %2607 = vpow2.f32 %v543_v3  ;;  %v545_v11 = vmul.f32 1.442695, %v528_v4  ;;  %v449_v12 = vadd.f32 %v3065_v46, %v448_v9  ;;  %v2261_v13 = vpop.f32.mrb[6].mxu0  ;;  %v507_v9 = vld [vmem:[%s2962_s15 + $0x60] sm:$0xff] }
 0x145   : > { %2609 = vpow2.f32 %v549_v7  ;;  %v3092_v15 = vadd.f32 %v501_v6, %v457_v8  ;;  %v460_v16 = vadd.f32 %v2261_v13, %v3065_v46  ;;  %v451_v17 = vpop.f32.mrb[7].mxu0  ;;  %v510_v13 = vld [vmem:[%s2962_s15 + $0x78] sm:$0xff] }
 0x146   : > { %2611 = vpow2.f32 %v545_v11  ;;  %v3096_v19 = vadd.f32 %v499_v10, %v449_v12  ;;  %v452_v20 = vadd.f32 %v3065_v46, %v451_v17 }
 0x147   : > { %v533_v21 = vsub.f32 0.0, %v3092_v15  ;;  %v3100_v22 = vadd.f32 %v502_v14, %v460_v16 }
 0x148   : > { %v531_v23 = vsub.f32 0.0, %v3096_v19  ;;  %v3103_v24 = vadd.f32 %v500_v18, %v452_v20  ;;  %v508_v20 = vld [vmem:[%s2962_s15 + $0x68] sm:$0xff] }
 0x149   : > { %v555_v25 = vmul.f32 1.442695, %v533_v21  ;;  %v534_v26 = vsub.f32 0.0, %v3100_v22 }
 0x14a   : > { %v551_v27 = vmul.f32 1.442695, %v531_v23  ;;  %v532_v28 = vsub.f32 0.0, %v3103_v24  ;;  %v2264_v29 = vpop.f32.mrb[8].mxu0 }
 0x14b   : > { %2613 = vpow2.f32 %v555_v25  ;;  %v557_v31 = vmul.f32 1.442695, %v534_v26  ;;  %v473_v32 = vadd.f32 %v2264_v29, %v3065_v46  ;;  %v464_v33 = vpop.f32.mrb[9].mxu0 }
 0x14c   : > { %2615 = vpow2.f32 %v551_v27  ;;  %v553_v35 = vmul.f32 1.442695, %v532_v28  ;;  %v465_v36 = vadd.f32 %v3065_v46, %v464_v33  ;;  %v2265_v37 = vpop.f32.mrb[10].mxu0 }
 0x14d   : > { %v2606_v39 = vpop.eup %2605  ;;  %2617 = vpow2.f32 %v557_v31  ;;  %v3112_v40 = vadd.f32 %v505_v30, %v473_v32  ;;  %v476_v41 = vadd.f32 %v2265_v37, %v3065_v46  ;;  %v467_v42 = vpop.f32.mrb[11].mxu0 }
 0x14e   : > { %v2608_v47 = vpop.eup %2607  ;;  %v577_v48 = vadd.f32 1.0, %v2606_v39  ;;  %2619 = vpow2.f32 %v553_v35  ;;  %v3116_v49 = vadd.f32 %v503_v34, %v465_v36  ;;  %v468_v50 = vadd.f32 %v3065_v46, %v467_v42 }
 0x14f   : > { %v2610_v51 = vpop.eup %2609  ;;  %v575_v52 = vadd.f32 1.0, %v2608_v47  ;;  %v537_v53 = vsub.f32 0.0, %v3112_v40  ;;  %v3120_v54 = vadd.f32 %v506_v38, %v476_v41 }
 0x150   : > { %v2612_v56 = vpop.eup %2611  ;;  %2621 = vrcp.f32 %v577_v48  ;;  %v578_v57 = vadd.f32 1.0, %v2610_v51  ;;  %v535_v58 = vsub.f32 0.0, %v3116_v49  ;;  %v3123_v60 = vadd.f32 %v504_v43, %v468_v50 }
 0x151   : > { %2623 = vrcp.f32 %v575_v52  ;;  %v576_v61 = vadd.f32 1.0, %v2612_v56  ;;  %v563_v63 = vmul.f32 1.442695, %v537_v53  ;;  %v538_v1 = vsub.f32 0.0, %v3120_v54 }
 0x152   : > { %2625 = vrcp.f32 %v578_v57  ;;  %v559_v2 = vmul.f32 1.442695, %v535_v58  ;;  %v536_v3 = vsub.f32 0.0, %v3123_v60  ;;  %v2268_v4 = vpop.f32.mrb[12].mxu0 }
 0x153   : > { %2627 = vrcp.f32 %v576_v61  ;;  %v565_v6 = vmul.f32 1.442695, %v538_v1  ;;  %v489_v7 = vadd.f32 %v2268_v4, %v3065_v46  ;;  %v480_v8 = vpop.f32.mrb[13].mxu0 }
 0x154   : > { %2629 = vpow2.f32 %v563_v63  ;;  %v561_v10 = vmul.f32 1.442695, %v536_v3  ;;  %v481_v11 = vadd.f32 %v3065_v46, %v480_v8  ;;  %v2269_v12 = vpop.f32.mrb[14].mxu0 }
 0x155   : > { %v2614_v14 = vpop.eup %2613  ;;  %2631 = vpow2.f32 %v559_v2  ;;  %v3132_v16 = vadd.f32 %v509_v5, %v489_v7  ;;  %v492_v17 = vadd.f32 %v2269_v12, %v3065_v46  ;;  %v483_v18 = vpop.f32.mrb[15].mxu0 }
 0x156   : > { %v2616_v21 = vpop.eup %2615  ;;  %v581_v23 = vadd.f32 1.0, %v2614_v14  ;;  %2633 = vpow2.f32 %v565_v6  ;;  %v3136_v25 = vadd.f32 %v507_v9, %v481_v11  ;;  %v484_v26 = vadd.f32 %v3065_v46, %v483_v18  ;;  %v2578_v11 = vld [vmem:[%s3598_s4 + $0xd0] sm:$0xff]  }
 0x157   : > { %v2618_v27 = vpop.eup %2617  ;;  %v579_v28 = vadd.f32 1.0, %v2616_v21  ;;  %2635 = vpow2.f32 %v561_v10  ;;  %v541_v29 = vsub.f32 0.0, %v3132_v16  ;;  %v3140_v30 = vadd.f32 %v510_v13, %v492_v17  ;;  %v2577_v10 = vld [vmem:[%s3598_s4 + $0x90] sm:$0xff]  }
 0x158   : > { %v2620_v31 = vpop.eup %2619  ;;  %2637 = vrcp.f32 %v581_v23  ;;  %v582_v32 = vadd.f32 1.0, %v2618_v27  ;;  %v539_v33 = vsub.f32 0.0, %v3136_v25  ;;  %v3143_v34 = vadd.f32 %v508_v20, %v484_v26 }
 0x159   : > { %2639 = vrcp.f32 %v579_v28  ;;  %v580_v35 = vadd.f32 1.0, %v2620_v31  ;;  %v571_v36 = vmul.f32 1.442695, %v541_v29  ;;  %v542_v37 = vsub.f32 0.0, %v3140_v30  ;;  %v2581_v29 = vld [vmem:[%s3598_s4 + $0xa0] sm:$0xff]  }
 0x15a   : > { %v2622_v46 = vpop.eup %2621  ;;  %2641 = vrcp.f32 %v582_v32  ;;  %v567_v38 = vmul.f32 1.442695, %v539_v33  ;;  %v540_v39 = vsub.f32 0.0, %v3143_v34  ;;  %v2582_v31 = vld [vmem:[%s3598_s4 + $0xe0] sm:$0xff]  }
 0x15b   : > { %v2624_v41 = vpop.eup %2623  ;;  %2643 = vrcp.f32 %v580_v35  ;;  %v573_v42 = vmul.f32 1.442695, %v542_v37  ;;  %v609_v50 = vmul.f32 %v2622_v46, %v3072_v55 }
 0x15c   : > { %v2626_v43 = vpop.eup %2625  ;;  %2645 = vpow2.f32 %v571_v36  ;;  %v569_v47 = vmul.f32 1.442695, %v540_v39  ;;  %v607_v53 = vmul.f32 %v2624_v41, %v3076_v59  ;;  %v2576_v59 = vld [vmem:[%s3598_s4 + $0xc8] sm:$0xff]  }
 0x15d   : > { %v2628_v48 = vpop.eup %2627  ;;  %v610_v51 = vmul.f32 %v2626_v43, %v3080_v62  ;;  %2647 = vpow2.f32 %v567_v38  ;;  %v2575_v62 = vld [vmem:[%s3598_s4 + $0x88] sm:$0xff]  }
 0x15e   : > { %v2630_v52 = vpop.eup %2629  ;;  %v608_v56 = vmul.f32 %v2628_v48, %v3083_v0  ;;  %2649 = vpow2.f32 %v573_v42  ;;  %v2583_v39 = vld [vmem:[%s3598_s4 + $0xa8] sm:$0xff]   ;;  %v2586_v48 = vld [vmem:[%s3598_s4 + $0xf0] sm:$0xff]  }
 0x15f   : > { %v2632_v57 = vpop.eup %2631  ;;  %v3151_v58 = vpack.c.bf16 %v610_v51, %v609_v50  ;;  %v585_v61 = vadd.f32 1.0, %v2630_v52  ;;  %2651 = vpow2.f32 %v569_v47  ;;  %v2585_v47 = vld [vmem:[%s3598_s4 + $0xb0] sm:$0xff]  }
 0x160   : > { %v2634_v63 = vpop.eup %2633  ;;  %v3153_v1 = vpack.c.bf16 %v608_v56, %v607_v53  ;;  %v583_v2 = vadd.f32 1.0, %v2632_v57  ;;  %v2591_v56 = vld [vmem:[%s3598_s4 + $0x108] sm:$0xff]  }
 0x161   : > { %v2636_v3 = vpop.eup %2635  ;;  %2653 = vrcp.f32 %v585_v61  ;;  %v586_v55 = vadd.f32 1.0, %v2634_v63  ;;  %v3257_v57 = vld [vmem:[%s3598_s4 + $0x148] sm:$0xff]   ;;  %v2593_v61 = vld [vmem:[%s3598_s4 + $0x110] sm:$0xff]  }
 0x162   : > { %v2638_v0 = vpop.eup %2637  ;;  %2655 = vrcp.f32 %v583_v2  ;;  %v584_v4 = vadd.f32 1.0, %v2636_v3  ;;  %2286 = vmatprep.mubr.bf16.mxu1 %v3153_v1  ;;  %2318 = vmatprep.mubr.bf16.mxu0 %v3153_v1  ;;  %v2594_v63 = vld [vmem:[%s3598_s4 + $0x150] sm:$0xff]   ;;  %v2595_v2 = vld [vmem:[%s3598_s4 + $0x118] sm:$0xff]  }
 0x163   : > { %v2640_v5 = vpop.eup %2639  ;;  %2657 = vrcp.f32 %v586_v55  ;;  %2287 = vmatmul.mubr.bf16.vlgmr.msra.gmra.mrb[0].mxu1 %v3151_v58  ;;  %2319 = vmatmul.mubr.bf16.vlgmr.msra.gmra.mrb[16].mxu0 %v3151_v58  ;;  %v613_v8 = vmul.f32 %v2638_v0, %v3092_v15  ;;  %v2596_v3 = vld [vmem:[%s3598_s4 + $0x158] sm:$0xff]   ;;  %v2597_v55 = vld [vmem:[%s3598_s4 + $0x120] sm:$0xff]   ;;  %v2600_v0 = vld [vmem:[%s3598_s4 + $0x168] sm:$0xff]  }
 0x164   : > { %v2642_v6 = vpop.eup %2641  ;;  %2659 = vrcp.f32 %v584_v4  ;;  %2335 = vmatpush3.bf16.msra.mxu1 %v3053_v44  ;;  %2367 = vmatpush3.bf16.msra.mxu0 %v3058_v45  ;;  %v611_v44 = vmul.f32 %v2640_v5, %v3096_v19  ;;  %v2579_v19 = vld [vmem:[%s3598_s4 + $0x98] sm:$0xff]   ;;  %v2601_v4 = vld [vmem:[%s3598_s4 + $0x130] sm:$0xff]  }
 0x165   : > { %v2644_v7 = vpop.eup %2643  ;;  %v614_v9 = vmul.f32 %v2642_v6, %v3100_v22  ;;  %2336 = vmatprep.subr.bf16.mxu1 %v2575_v62  ;;  %2368 = vmatprep.subr.bf16.mxu0 %v2576_v59  ;;  %v2602_v5 = vld [vmem:[%s3598_s4 + $0x170] sm:$0xff]   ;;  %v2603_v6 = vld [vmem:[%s3598_s4 + $0x138] sm:$0xff]  }
 0x166   : > { %v2646_v12 = vpop.eup %2645  ;;  %v612_v45 = vmul.f32 %v2644_v7, %v3103_v24  ;;  %v2580_v24 = vld [vmem:[%s3598_s4 + $0xd8] sm:$0xff]  }
 0x167   : > { %v2648_v13 = vpop.eup %2647  ;;  %v3177_v14 = vpack.c.bf16 %v614_v9, %v613_v8  ;;  %v589_v15 = vadd.f32 1.0, %v2646_v12  ;;  %v2604_v7 = vld [vmem:[%s3598_s4 + $0x178] sm:$0xff]  }
 0x168   : > { %v2650_v22 = vpop.eup %2649  ;;  %v3179_v17 = vpack.c.bf16 %v612_v45, %v611_v44  ;;  %v587_v18 = vadd.f32 1.0, %v2648_v13  ;;  %2337 = vmatpush3.bf16.msra.mxu1 %v2575_v62  ;;  %2369 = vmatpush3.bf16.msra.mxu0 %v2576_v59  ;;  %v2598_v62 = vld [vmem:[%s3598_s4 + $0x160] sm:$0xff]   ;;  %v2599_v59 = vld [vmem:[%s3598_s4 + $0x128] sm:$0xff]  }
 0x169   : > { %v2652_v20 = vpop.eup %2651  ;;  %2661 = vrcp.f32 %v589_v15  ;;  %v590_v21 = vadd.f32 1.0, %v2650_v22  ;;  %2338 = vmatprep.subr.bf16.mxu1 %v2577_v10  ;;  %2370 = vmatprep.subr.bf16.mxu0 %v2578_v11 }
 0x16a   : > { %2663 = vrcp.f32 %v587_v18  ;;  %v588_v23 = vadd.f32 1.0, %v2652_v20  ;;  %2290 = vmatprep.mubr.bf16.mxu1 %v3179_v17  ;;  %2322 = vmatprep.mubr.bf16.mxu0 %v3179_v17 }
 0x16b   : > { %v2654_v26 = vpop.eup %2653  ;;  %2665 = vrcp.f32 %v590_v21  ;;  %2291 = vmatmul.mubr.bf16.gmra.mrb[4].mxu1 %v3177_v14  ;;  %2323 = vmatmul.mubr.bf16.gmra.mrb[20].mxu0 %v3177_v14 }
 0x16c   : > { %v2656_v27 = vpop.eup %2655  ;;  %2667 = vrcp.f32 %v588_v23  ;;  %2339 = vmatpush3.bf16.msra.mxu1 %v2577_v10  ;;  %2371 = vmatpush3.bf16.msra.mxu0 %v2578_v11  ;;  %v617_v33 = vmul.f32 %v2654_v26, %v3112_v40  ;;  %v2584_v40 = vld [vmem:[%s3598_s4 + $0xe8] sm:$0xff]  }
 0x16d   : > { %v2658_v28 = vpop.eup %2657  ;;  %2340 = vmatprep.subr.bf16.mxu1 %v2579_v19  ;;  %2372 = vmatprep.subr.bf16.mxu0 %v2580_v24  ;;  %v615_v36 = vmul.f32 %v2656_v27, %v3116_v49 }
 0x16e   : > { %v2660_v32 = vpop.eup %2659  ;;  %v618_v35 = vmul.f32 %v2658_v28, %v3120_v54 }
 0x16f   : > { %v616_v37 = vmul.f32 %v2660_v32, %v3123_v60 }
 0x170   : > { %v3201_v46 = vpack.c.bf16 %v618_v35, %v617_v33  ;;  %2341 = vmatpush3.bf16.msra.mxu1 %v2579_v19  ;;  %2373 = vmatpush3.bf16.msra.mxu0 %v2580_v24 }
 0x171   : > { %v3203_v38 = vpack.c.bf16 %v616_v37, %v615_v36  ;;  %2342 = vmatprep.subr.bf16.mxu1 %v2581_v29  ;;  %2374 = vmatprep.subr.bf16.mxu0 %v2582_v31 }
 0x173   : > { %v2662_v54 = vpop.eup %2661  ;;  %2294 = vmatprep.mubr.bf16.mxu1 %v3203_v38  ;;  %2326 = vmatprep.mubr.bf16.mxu0 %v3203_v38 }
 0x174   : > { %v2664_v49 = vpop.eup %2663  ;;  %2295 = vmatmul.mubr.bf16.gmra.mrb[8].mxu1 %v3201_v46  ;;  %2327 = vmatmul.mubr.bf16.gmra.mrb[24].mxu0 %v3201_v46  ;;  %v621_v42 = vmul.f32 %v2662_v54, %v3132_v16  ;;  %v2587_v16 = vld [vmem:[%s3598_s4 + $0xb8] sm:$0xff]  }
 0x175   : > { %v2666_v60 = vpop.eup %2665  ;;  %2343 = vmatpush3.bf16.msra.mxu1 %v2581_v29  ;;  %2375 = vmatpush3.bf16.msra.mxu0 %v2582_v31  ;;  %v619_v50 = vmul.f32 %v2664_v49, %v3136_v25  ;;  %v2588_v25 = vld [vmem:[%s3598_s4 + $0xf8] sm:$0xff]  }
 0x176   : > { %v2668_v41 = vpop.eup %2667  ;;  %v622_v43 = vmul.f32 %v2666_v60, %v3140_v30  ;;  %2344 = vmatprep.subr.bf16.mxu1 %v2583_v39  ;;  %2376 = vmatprep.subr.bf16.mxu0 %v2584_v40  ;;  %v2589_v30 = vld [vmem:[%s3598_s4 + $0x100] sm:$0xff]  }
 0x177   : > { %v620_v51 = vmul.f32 %v2668_v41, %v3143_v34  ;;  %v3247_v34 = vld [vmem:[%s3598_s4 + $0x140] sm:$0xff]  }
 0x178   : > { %v3225_v52 = vpack.c.bf16 %v622_v43, %v621_v42 }
 0x179   : > { %v3227_v53 = vpack.c.bf16 %v620_v51, %v619_v50  ;;  %2345 = vmatpush3.bf16.msra.mxu1 %v2583_v39  ;;  %2377 = vmatpush3.bf16.msra.mxu0 %v2584_v40 }
 0x17a   : > { %2346 = vmatprep.subr.bf16.mxu1 %v2585_v47  ;;  %2378 = vmatprep.subr.bf16.mxu0 %v2586_v48 }
 0x17b   : > { %2298 = vmatprep.mubr.bf16.mxu1 %v3227_v53  ;;  %2330 = vmatprep.mubr.bf16.mxu0 %v3227_v53 }
 0x17c   : > { %2299 = vmatmul.mubr.bf16.gmra.mrb[12].mxu1 %v3225_v52  ;;  %2331 = vmatmul.mubr.bf16.gmra.mrb[28].mxu0 %v3225_v52 }
 0x17d   : > { %2347 = vmatpush3.bf16.msra.mxu1 %v2585_v47  ;;  %2350 = vmatprep.mubr.bf16.mxu1 %v3153_v1 }
 0x17e   : > { %2379 = vmatpush3.bf16.msra.mxu0 %v2586_v48  ;;  %2382 = vmatprep.mubr.bf16.mxu0 %v3153_v1 }
 0x17f   : > { %2348 = vmatprep.subr.bf16.mxu1 %v2587_v16  ;;  %2380 = vmatprep.subr.bf16.mxu0 %v2588_v25 }
 0x181   : > { %2349 = vmatpush3.bf16.msra.mxu1 %v2587_v16 }
 0x182   : > { %2381 = vmatpush3.bf16.msra.mxu0 %v2588_v25  ;;  %2398 = vmatprep.subr.bf16.mxu1 %v2589_v30 }
 0x183   : > { %2430 = vmatprep.subr.bf16.mxu0 %v3247_v34 }
 0x184   : > { %2351 = vmatmul.mubr.bf16.vlgmr.msra.gmra.mrb[16].mxu1 %v3151_v58 }
 0x185   : > { %2383 = vmatmul.mubr.bf16.vlgmr.msra.gmra.mrb[32].mxu0 %v3151_v58  ;;  %2399 = vmatpush3.bf16.msra.mxu1 %v2589_v30 }
 0x186   : > { %2354 = vmatprep.mubr.bf16.mxu1 %v3179_v17  ;;  %2386 = vmatprep.mubr.bf16.mxu0 %v3179_v17 }
 0x187   : > { %2431 = vmatpush3.bf16.msra.mxu0 %v3247_v34  ;;  %2400 = vmatprep.subr.bf16.mxu1 %v2591_v56 }
 0x188   : > { %2432 = vmatprep.subr.bf16.mxu0 %v3257_v57 }
 0x189   : > { %2401 = vmatpush3.bf16.msra.mxu1 %v2591_v56 }
 0x18a   : > { %2402 = vmatprep.subr.bf16.mxu1 %v2593_v61 }
 0x18b   : > { %2433 = vmatpush3.bf16.msra.mxu0 %v3257_v57 }
 0x18c   : > { %2355 = vmatmul.mubr.bf16.gmra.mrb[20].mxu1 %v3177_v14  ;;  %2434 = vmatprep.subr.bf16.mxu0 %v2594_v63 }
 0x18d   : > { %2387 = vmatmul.mubr.bf16.gmra.mrb[36].mxu0 %v3177_v14  ;;  %2403 = vmatpush3.bf16.msra.mxu1 %v2593_v61 }
 0x18e   : > { %2358 = vmatprep.mubr.bf16.mxu1 %v3203_v38  ;;  %2390 = vmatprep.mubr.bf16.mxu0 %v3203_v38 }
 0x18f   : > { %2435 = vmatpush3.bf16.msra.mxu0 %v2594_v63  ;;  %2404 = vmatprep.subr.bf16.mxu1 %v2595_v2 }
 0x190   : > { %2436 = vmatprep.subr.bf16.mxu0 %v2596_v3 }
 0x191   : > { %2405 = vmatpush3.bf16.msra.mxu1 %v2595_v2 }
 0x192   : > { %2406 = vmatprep.subr.bf16.mxu1 %v2597_v55 }
 0x193   : > { %2437 = vmatpush3.bf16.msra.mxu0 %v2596_v3 }
 0x194   : > { %2359 = vmatmul.mubr.bf16.gmra.mrb[24].mxu1 %v3201_v46  ;;  %2438 = vmatprep.subr.bf16.mxu0 %v2598_v62 }
 0x195   : > { %2391 = vmatmul.mubr.bf16.gmra.mrb[40].mxu0 %v3201_v46  ;;  %2407 = vmatpush3.bf16.msra.mxu1 %v2597_v55 }
 0x196   : > { %2362 = vmatprep.mubr.bf16.mxu1 %v3227_v53  ;;  %2394 = vmatprep.mubr.bf16.mxu0 %v3227_v53 }
 0x197   : > { %2439 = vmatpush3.bf16.msra.mxu0 %v2598_v62  ;;  %2408 = vmatprep.subr.bf16.mxu1 %v2599_v59 }
 0x198   : > { %2440 = vmatprep.subr.bf16.mxu0 %v2600_v0 }
 0x199   : > { %2409 = vmatpush3.bf16.msra.mxu1 %v2599_v59 }
 0x19a   : > { %2410 = vmatprep.subr.bf16.mxu1 %v2601_v4 }
 0x19b   : > { %2441 = vmatpush3.bf16.msra.mxu0 %v2600_v0 }
 0x19c   : > { %2363 = vmatmul.mubr.bf16.gmra.mrb[28].mxu1 %v3225_v52  ;;  %2442 = vmatprep.subr.bf16.mxu0 %v2602_v5 }
 0x19d   : > { %2395 = vmatmul.mubr.bf16.gmra.mrb[44].mxu0 %v3225_v52  ;;  %2411 = vmatpush3.bf16.msra.mxu1 %v2601_v4 }
 0x19e   : > { %2414 = vmatprep.mubr.bf16.mxu1 %v3153_v1  ;;  %2446 = vmatprep.mubr.bf16.mxu0 %v3153_v1  ;;  %v3340_v1 = vld [vmem:[%s3599_s5 + $0x1] ss:$0 sm:$0xff] }
 0x19f   : > { %2443 = vmatpush3.bf16.msra.mxu0 %v2602_v5  ;;  %2412 = vmatprep.subr.bf16.mxu1 %v2603_v6 }
 0x1a0   : > { %2444 = vmatprep.subr.bf16.mxu0 %v2604_v7 }
 0x1a1   : > { %2413 = vmatpush3.bf16.msra.mxu1 %v2603_v6 }
 0x1a2   : > { %2462 = vmatprep.subr.bf16.mxu1 %v3247_v34 }
 0x1a3   : > { %2445 = vmatpush3.bf16.msra.mxu0 %v2604_v7 }
 0x1a4   : > { %2415 = vmatmul.mubr.bf16.vlgmr.msra.gmra.mrb[32].mxu1 %v3151_v58 }
 0x1a5   : > { %2470 = vmatpush3.bf16.msra.mxu1 %v3247_v34  ;;  %2418 = vmatprep.mubr.bf16.mxu1 %v3179_v17 }
 0x1a6   : > { %2447 = vmatmul.mubr.bf16.vlgmr.msra.gmra.mrb[48].mxu0 %v3151_v58  ;;  %2463 = vmatprep.subr.bf16.mxu1 %v3257_v57  ;;  %v3335_v58 = vld [vmem:[%s3599_s5] ss:$0 sm:$0xff] }
 0x1a7   : > { %2450 = vmatprep.mubr.bf16.mxu0 %v3179_v17 }
 0x1a9   : > { %2471 = vmatpush3.bf16.msra.mxu1 %v3257_v57 }
 0x1aa   : > { %2464 = vmatprep.subr.bf16.mxu1 %v2594_v63 }
 0x1ac   : > { %2419 = vmatmul.mubr.bf16.gmra.mrb[36].mxu1 %v3177_v14 }
 0x1ad   : > { %2472 = vmatpush3.bf16.msra.mxu1 %v2594_v63  ;;  %2422 = vmatprep.mubr.bf16.mxu1 %v3203_v38 }
 0x1ae   : > { %2451 = vmatmul.mubr.bf16.gmra.mrb[52].mxu0 %v3177_v14  ;;  %2465 = vmatprep.subr.bf16.mxu1 %v2596_v3 }
 0x1af   : > { %2454 = vmatprep.mubr.bf16.mxu0 %v3203_v38 }
 0x1b1   : > { %2473 = vmatpush3.bf16.msra.mxu1 %v2596_v3 }
 0x1b2   : > { %2466 = vmatprep.subr.bf16.mxu1 %v2598_v62 }
 0x1b4   : > { %2423 = vmatmul.mubr.bf16.gmra.mrb[40].mxu1 %v3201_v46 }
 0x1b5   : > { %2474 = vmatpush3.bf16.msra.mxu1 %v2598_v62  ;;  %2426 = vmatprep.mubr.bf16.mxu1 %v3227_v53 }
 0x1b6   : > { %2455 = vmatmul.mubr.bf16.gmra.mrb[56].mxu0 %v3201_v46  ;;  %2467 = vmatprep.subr.bf16.mxu1 %v2600_v0 }
 0x1b9   : > { %2475 = vmatpush3.bf16.msra.mxu1 %v2600_v0 }
 0x1ba   : > { %2468 = vmatprep.subr.bf16.mxu1 %v2602_v5 }
 0x1bc   : > { %2427 = vmatmul.mubr.bf16.gmra.mrb[44].mxu1 %v3225_v52 }
 0x1bd   : > { %2476 = vmatpush3.bf16.msra.mxu1 %v2602_v5  ;;  %2458 = vmatprep.mubr.bf16.mxu1 %v3227_v53 }
 0x1be   : > { %2469 = vmatprep.subr.bf16.mxu1 %v2604_v7 }
 0x1c1   : > { %2477 = vmatpush3.bf16.msra.mxu1 %v2604_v7 }
 0x1c4   : > { %2459 = vmatmul.mubr.bf16.vlgmr.msra.gmra.mrb[48].mxu1 %v3225_v52 }
 0x236   : > { %v2288_v8 = vpop.f32.mrb[0].mxu1  ;;  %v2320_v9 = vpop.f32.mrb[16].mxu0 }
 0x237   : > { %v745_v10 = vadd.f32 %v2288_v8, %v3335_v58  ;;  %v931_v11 = vadd.f32 %v2320_v9, %v3340_v1  ;;  %v736_v12 = vpop.f32.mrb[1].mxu1  ;;  %v922_v44 = vpop.f32.mrb[17].mxu0 }
 0x238   : > { %v737_v45 = vadd.f32 %v3335_v58, %v736_v12  ;;  %v923_v13 = vadd.f32 %v3340_v1, %v922_v44  ;;  %v2289_v14 = vpop.f32.mrb[2].mxu1  ;;  %v2321_v15 = vpop.f32.mrb[18].mxu0 }
 0x239   : > { %801 = vst [vmem:[%s3346_s8 + $0x10] sm:$0xff] %v745_v10  ;;  %1950 = vst [vmem:[%s3346_s8 + $0x90] sm:$0xff] %v931_v11  ;;  %v748_v22 = vadd.f32 %v2289_v14, %v3335_v58  ;;  %v934_v17 = vadd.f32 %v2321_v15, %v3340_v1  ;;  %v739_v18 = vpop.f32.mrb[3].mxu1  ;;  %v925_v20 = vpop.f32.mrb[19].mxu0  ;;  %v3411_v10 = vld [vmem:[%s3599_s5 + $0x2] ss:$0 sm:$0xff] }
 0x23a   : > { %799 = vst [vmem:[%s3346_s8] sm:$0xff] %v737_v45  ;;  %1948 = vst [vmem:[%s3346_s8 + $0x80] sm:$0xff] %v923_v13  ;;  %v740_v21 = vadd.f32 %v3335_v58, %v739_v18  ;;  %v926_v19 = vadd.f32 %v3340_v1, %v925_v20  ;;  %v3416_v11 = vld [vmem:[%s3599_s5 + $0x3] ss:$0 sm:$0xff] }
 0x23b   : > { %802 = vst [vmem:[%s3346_s8 + $0x18] sm:$0xff] %v748_v22  ;;  %1951 = vst [vmem:[%s3346_s8 + $0x98] sm:$0xff] %v934_v17 }
 0x23c   : > { %800 = vst [vmem:[%s3346_s8 + $0x8] sm:$0xff] %v740_v21  ;;  %1949 = vst [vmem:[%s3346_s8 + $0x88] sm:$0xff] %v926_v19 }
 0x23e   : > { %v2292_v24 = vpop.f32.mrb[4].mxu1  ;;  %v2324_v23 = vpop.f32.mrb[20].mxu0 }
 0x23f   : > { %v761_v26 = vadd.f32 %v2292_v24, %v3335_v58  ;;  %v947_v27 = vadd.f32 %v2324_v23, %v3340_v1  ;;  %v752_v28 = vpop.f32.mrb[5].mxu1  ;;  %v938_v29 = vpop.f32.mrb[21].mxu0 }
 0x240   : > { %v753_v31 = vadd.f32 %v3335_v58, %v752_v28  ;;  %v939_v32 = vadd.f32 %v3340_v1, %v938_v29  ;;  %v2293_v33 = vpop.f32.mrb[6].mxu1  ;;  %v2325_v35 = vpop.f32.mrb[22].mxu0 }
 0x241   : > { %805 = vst [vmem:[%s3346_s8 + $0x30] sm:$0xff] %v761_v26  ;;  %1954 = vst [vmem:[%s3346_s8 + $0xb0] sm:$0xff] %v947_v27  ;;  %v764_v36 = vadd.f32 %v2293_v33, %v3335_v58  ;;  %v950_v37 = vadd.f32 %v2325_v35, %v3340_v1  ;;  %v755_v46 = vpop.f32.mrb[7].mxu1  ;;  %v941_v38 = vpop.f32.mrb[23].mxu0 }
 0x242   : > { %803 = vst [vmem:[%s3346_s8 + $0x20] sm:$0xff] %v753_v31  ;;  %1952 = vst [vmem:[%s3346_s8 + $0xa0] sm:$0xff] %v939_v32  ;;  %v756_v39 = vadd.f32 %v3335_v58, %v755_v46  ;;  %v942_v40 = vadd.f32 %v3340_v1, %v941_v38 }
 0x243   : > { %806 = vst [vmem:[%s3346_s8 + $0x38] sm:$0xff] %v764_v36  ;;  %1955 = vst [vmem:[%s3346_s8 + $0xb8] sm:$0xff] %v950_v37 }
 0x244   : > { %804 = vst [vmem:[%s3346_s8 + $0x28] sm:$0xff] %v756_v39  ;;  %1953 = vst [vmem:[%s3346_s8 + $0xa8] sm:$0xff] %v942_v40 }
 0x247   : > { %v2296_v54 = vpop.f32.mrb[8].mxu1  ;;  %v2328_v49 = vpop.f32.mrb[24].mxu0 }
 0x248   : > { %v777_v60 = vadd.f32 %v2296_v54, %v3335_v58  ;;  %v963_v41 = vadd.f32 %v2328_v49, %v3340_v1  ;;  %v768_v42 = vpop.f32.mrb[9].mxu1  ;;  %v954_v43 = vpop.f32.mrb[25].mxu0 }
 0x249   : > { %v769_v47 = vadd.f32 %v3335_v58, %v768_v42  ;;  %v955_v48 = vadd.f32 %v3340_v1, %v954_v43  ;;  %v2297_v50 = vpop.f32.mrb[10].mxu1  ;;  %v2329_v51 = vpop.f32.mrb[26].mxu0 }
 0x24a   : > { %809 = vst [vmem:[%s3346_s8 + $0x50] sm:$0xff] %v777_v60  ;;  %1958 = vst [vmem:[%s3346_s8 + $0xd0] sm:$0xff] %v963_v41  ;;  %v780_v52 = vadd.f32 %v2297_v50, %v3335_v58  ;;  %v966_v53 = vadd.f32 %v2329_v51, %v3340_v1  ;;  %v771_v16 = vpop.f32.mrb[11].mxu1  ;;  %v957_v25 = vpop.f32.mrb[27].mxu0 }
 0x24b   : > { %807 = vst [vmem:[%s3346_s8 + $0x40] sm:$0xff] %v769_v47  ;;  %1956 = vst [vmem:[%s3346_s8 + $0xc0] sm:$0xff] %v955_v48  ;;  %v772_v30 = vadd.f32 %v3335_v58, %v771_v16  ;;  %v958_v34 = vadd.f32 %v3340_v1, %v957_v25 }
 0x24c   : > { %810 = vst [vmem:[%s3346_s8 + $0x58] sm:$0xff] %v780_v52  ;;  %1959 = vst [vmem:[%s3346_s8 + $0xd8] sm:$0xff] %v966_v53 }
 0x24d   : > { %808 = vst [vmem:[%s3346_s8 + $0x48] sm:$0xff] %v772_v30  ;;  %1957 = vst [vmem:[%s3346_s8 + $0xc8] sm:$0xff] %v958_v34 }
 0x24f   : > { %v2300_v56 = vpop.f32.mrb[12].mxu1  ;;  %v2332_v57 = vpop.f32.mrb[28].mxu0 }
 0x250   : > { %v793_v61 = vadd.f32 %v2300_v56, %v3335_v58  ;;  %v979_v63 = vadd.f32 %v2332_v57, %v3340_v1  ;;  %v784_v2 = vpop.f32.mrb[13].mxu1  ;;  %v970_v3 = vpop.f32.mrb[29].mxu0 }
 0x251   : > { %v785_v55 = vadd.f32 %v3335_v58, %v784_v2  ;;  %v971_v62 = vadd.f32 %v3340_v1, %v970_v3  ;;  %v2301_v59 = vpop.f32.mrb[14].mxu1  ;;  %v2333_v0 = vpop.f32.mrb[30].mxu0 }
 0x252   : > { %813 = vst [vmem:[%s3346_s8 + $0x70] sm:$0xff] %v793_v61  ;;  %1962 = vst [vmem:[%s3346_s8 + $0xf0] sm:$0xff] %v979_v63  ;;  %v796_v4 = vadd.f32 %v2301_v59, %v3335_v58  ;;  %v982_v5 = vadd.f32 %v2333_v0, %v3340_v1  ;;  %v787_v6 = vpop.f32.mrb[15].mxu1  ;;  %v973_v7 = vpop.f32.mrb[31].mxu0 }
 0x253   : > { %811 = vst [vmem:[%s3346_s8 + $0x60] sm:$0xff] %v785_v55  ;;  %1960 = vst [vmem:[%s3346_s8 + $0xe0] sm:$0xff] %v971_v62  ;;  %v788_v8 = vadd.f32 %v3335_v58, %v787_v6  ;;  %v974_v9 = vadd.f32 %v3340_v1, %v973_v7 }
 0x254   : > { %814 = vst [vmem:[%s3346_s8 + $0x78] sm:$0xff] %v796_v4  ;;  %1963 = vst [vmem:[%s3346_s8 + $0xf8] sm:$0xff] %v982_v5 }
 0x255   : > { %812 = vst [vmem:[%s3346_s8 + $0x68] sm:$0xff] %v788_v8  ;;  %1961 = vst [vmem:[%s3346_s8 + $0xe8] sm:$0xff] %v974_v9 }
 0x257   : > { %v2352_v58 = vpop.f32.mrb[16].mxu1 }
 0x258   : > { %v1118_v12 = vadd.f32 %v2352_v58, %v3411_v10  ;;  %v2384_v1 = vpop.f32.mrb[32].mxu0  ;;  %v1109_v44 = vpop.f32.mrb[17].mxu1 }
 0x259   : > { %v1305_v45 = vadd.f32 %v2384_v1, %v3416_v11  ;;  %v1110_v13 = vadd.f32 %v3411_v10, %v1109_v44  ;;  %v1296_v14 = vpop.f32.mrb[33].mxu0  ;;  %v2353_v15 = vpop.f32.mrb[18].mxu1  ;;  %v3484_v1 = vld [vmem:[%s3599_s5 + $0x4] ss:$0 sm:$0xff] }
 0x25a   : > { %1992 = vst [vmem:[%s3346_s8 + $0x110] sm:$0xff] %v1118_v12  ;;  %v1297_v22 = vadd.f32 %v3416_v11, %v1296_v14  ;;  %v1121_v17 = vadd.f32 %v2353_v15, %v3411_v10  ;;  %v2385_v18 = vpop.f32.mrb[34].mxu0  ;;  %v1112_v20 = vpop.f32.mrb[19].mxu1 }
 0x25b   : > { %2034 = vst [vmem:[%s3346_s8 + $0x190] sm:$0xff] %v1305_v45  ;;  %1990 = vst [vmem:[%s3346_s8 + $0x100] sm:$0xff] %v1110_v13  ;;  %v1308_v21 = vadd.f32 %v2385_v18, %v3416_v11  ;;  %v1113_v19 = vadd.f32 %v3411_v10, %v1112_v20  ;;  %v1299_v24 = vpop.f32.mrb[35].mxu0 }
 0x25c   : > { %2032 = vst [vmem:[%s3346_s8 + $0x180] sm:$0xff] %v1297_v22  ;;  %1993 = vst [vmem:[%s3346_s8 + $0x118] sm:$0xff] %v1121_v17  ;;  %v1300_v23 = vadd.f32 %v3416_v11, %v1299_v24 }
 0x25d   : > { %2035 = vst [vmem:[%s3346_s8 + $0x198] sm:$0xff] %v1308_v21  ;;  %1991 = vst [vmem:[%s3346_s8 + $0x108] sm:$0xff] %v1113_v19 }
 0x25e   : > { %2033 = vst [vmem:[%s3346_s8 + $0x188] sm:$0xff] %v1300_v23 }
 0x25f   : > { %v2356_v26 = vpop.f32.mrb[20].mxu1 }
 0x260   : > { %v1134_v27 = vadd.f32 %v2356_v26, %v3411_v10  ;;  %v2388_v28 = vpop.f32.mrb[36].mxu0  ;;  %v1125_v29 = vpop.f32.mrb[21].mxu1 }
 0x261   : > { %v1321_v31 = vadd.f32 %v2388_v28, %v3416_v11  ;;  %v1126_v32 = vadd.f32 %v3411_v10, %v1125_v29  ;;  %v1312_v33 = vpop.f32.mrb[37].mxu0  ;;  %v2357_v35 = vpop.f32.mrb[22].mxu1 }
 0x262   : > { %1996 = vst [vmem:[%s3346_s8 + $0x130] sm:$0xff] %v1134_v27  ;;  %v1313_v36 = vadd.f32 %v3416_v11, %v1312_v33  ;;  %v1137_v37 = vadd.f32 %v2357_v35, %v3411_v10  ;;  %v2389_v46 = vpop.f32.mrb[38].mxu0  ;;  %v1128_v38 = vpop.f32.mrb[23].mxu1 }
 0x263   : > { %2038 = vst [vmem:[%s3346_s8 + $0x1b0] sm:$0xff] %v1321_v31  ;;  %1994 = vst [vmem:[%s3346_s8 + $0x120] sm:$0xff] %v1126_v32  ;;  %v1324_v39 = vadd.f32 %v2389_v46, %v3416_v11  ;;  %v1129_v40 = vadd.f32 %v3411_v10, %v1128_v38  ;;  %v1315_v54 = vpop.f32.mrb[39].mxu0 }
 0x264   : > { %2036 = vst [vmem:[%s3346_s8 + $0x1a0] sm:$0xff] %v1313_v36  ;;  %1997 = vst [vmem:[%s3346_s8 + $0x138] sm:$0xff] %v1137_v37  ;;  %v1316_v49 = vadd.f32 %v3416_v11, %v1315_v54 }
 0x265   : > { %2039 = vst [vmem:[%s3346_s8 + $0x1b8] sm:$0xff] %v1324_v39  ;;  %1995 = vst [vmem:[%s3346_s8 + $0x128] sm:$0xff] %v1129_v40 }
 0x266   : > { %2037 = vst [vmem:[%s3346_s8 + $0x1a8] sm:$0xff] %v1316_v49 }
 0x267   : > { %v2360_v60 = vpop.f32.mrb[24].mxu1 }
 0x268   : > { %v1150_v41 = vadd.f32 %v2360_v60, %v3411_v10  ;;  %v2392_v42 = vpop.f32.mrb[40].mxu0  ;;  %v1141_v43 = vpop.f32.mrb[25].mxu1 }
 0x269   : > { %v1337_v47 = vadd.f32 %v2392_v42, %v3416_v11  ;;  %v1142_v48 = vadd.f32 %v3411_v10, %v1141_v43  ;;  %v1328_v50 = vpop.f32.mrb[41].mxu0  ;;  %v2361_v51 = vpop.f32.mrb[26].mxu1 }
 0x26a   : > { %2000 = vst [vmem:[%s3346_s8 + $0x150] sm:$0xff] %v1150_v41  ;;  %v1329_v52 = vadd.f32 %v3416_v11, %v1328_v50  ;;  %v1153_v53 = vadd.f32 %v2361_v51, %v3411_v10  ;;  %v2393_v16 = vpop.f32.mrb[42].mxu0  ;;  %v1144_v25 = vpop.f32.mrb[27].mxu1 }
 0x26b   : > { %2042 = vst [vmem:[%s3346_s8 + $0x1d0] sm:$0xff] %v1337_v47  ;;  %1998 = vst [vmem:[%s3346_s8 + $0x140] sm:$0xff] %v1142_v48  ;;  %v1340_v30 = vadd.f32 %v2393_v16, %v3416_v11  ;;  %v1145_v34 = vadd.f32 %v3411_v10, %v1144_v25  ;;  %v1331_v56 = vpop.f32.mrb[43].mxu0 }
 0x26c   : > { %2040 = vst [vmem:[%s3346_s8 + $0x1c0] sm:$0xff] %v1329_v52  ;;  %2001 = vst [vmem:[%s3346_s8 + $0x158] sm:$0xff] %v1153_v53  ;;  %v1332_v57 = vadd.f32 %v3416_v11, %v1331_v56 }
 0x26d   : > { %2043 = vst [vmem:[%s3346_s8 + $0x1d8] sm:$0xff] %v1340_v30  ;;  %1999 = vst [vmem:[%s3346_s8 + $0x148] sm:$0xff] %v1145_v34 }
 0x26e   : > { %2041 = vst [vmem:[%s3346_s8 + $0x1c8] sm:$0xff] %v1332_v57 }
 0x26f   : > { %v2364_v61 = vpop.f32.mrb[28].mxu1 }
 0x270   : > { %v1166_v63 = vadd.f32 %v2364_v61, %v3411_v10  ;;  %v2396_v2 = vpop.f32.mrb[44].mxu0  ;;  %v1157_v3 = vpop.f32.mrb[29].mxu1 }
 0x271   : > { %v1353_v55 = vadd.f32 %v2396_v2, %v3416_v11  ;;  %v1158_v62 = vadd.f32 %v3411_v10, %v1157_v3  ;;  %v1344_v59 = vpop.f32.mrb[45].mxu0  ;;  %v2365_v0 = vpop.f32.mrb[30].mxu1 }
 0x272   : > { %2004 = vst [vmem:[%s3346_s8 + $0x170] sm:$0xff] %v1166_v63  ;;  %v1345_v4 = vadd.f32 %v3416_v11, %v1344_v59  ;;  %v1169_v5 = vadd.f32 %v2365_v0, %v3411_v10  ;;  %v2397_v6 = vpop.f32.mrb[46].mxu0  ;;  %v1160_v7 = vpop.f32.mrb[31].mxu1 }
 0x273   : > { %2046 = vst [vmem:[%s3346_s8 + $0x1f0] sm:$0xff] %v1353_v55  ;;  %2002 = vst [vmem:[%s3346_s8 + $0x160] sm:$0xff] %v1158_v62  ;;  %v1356_v8 = vadd.f32 %v2397_v6, %v3416_v11  ;;  %v1161_v9 = vadd.f32 %v3411_v10, %v1160_v7  ;;  %v1347_v58 = vpop.f32.mrb[47].mxu0  ;;  %v3490_v10 = vld [vmem:[%s3599_s5 + $0x5] ss:$0 sm:$0xff] }
 0x274   : > { %2044 = vst [vmem:[%s3346_s8 + $0x1e0] sm:$0xff] %v1345_v4  ;;  %2005 = vst [vmem:[%s3346_s8 + $0x178] sm:$0xff] %v1169_v5  ;;  %v1348_v12 = vadd.f32 %v3416_v11, %v1347_v58 }
 0x275   : > { %2047 = vst [vmem:[%s3346_s8 + $0x1f8] sm:$0xff] %v1356_v8  ;;  %2003 = vst [vmem:[%s3346_s8 + $0x168] sm:$0xff] %v1161_v9 }
 0x276   : > { %2045 = vst [vmem:[%s3346_s8 + $0x1e8] sm:$0xff] %v1348_v12 }
 0x277   : > { %v2416_v44 = vpop.f32.mrb[32].mxu1 }
 0x278   : > { %v1492_v45 = vadd.f32 %v2416_v44, %v3484_v1  ;;  %v1483_v11 = vpop.f32.mrb[33].mxu1 }
 0x279   : > { %v2448_v13 = vpop.f32.mrb[48].mxu0  ;;  %v1484_v14 = vadd.f32 %v3484_v1, %v1483_v11  ;;  %v2417_v15 = vpop.f32.mrb[34].mxu1 }
 0x27a   : > { %2076 = vst [vmem:[%s3346_s8 + $0x210] sm:$0xff] %v1492_v45  ;;  %v1679_v22 = vadd.f32 %v2448_v13, %v3490_v10  ;;  %v1670_v17 = vpop.f32.mrb[49].mxu0  ;;  %v1495_v18 = vadd.f32 %v2417_v15, %v3484_v1  ;;  %v1486_v20 = vpop.f32.mrb[35].mxu1 }
 0x27b   : > { %2074 = vst [vmem:[%s3346_s8 + $0x200] sm:$0xff] %v1484_v14  ;;  %v1671_v21 = vadd.f32 %v3490_v10, %v1670_v17  ;;  %v2449_v19 = vpop.f32.mrb[50].mxu0  ;;  %v1487_v24 = vadd.f32 %v3484_v1, %v1486_v20 }
 0x27c   : > { %2118 = vst [vmem:[%s3346_s8 + $0x290] sm:$0xff] %v1679_v22  ;;  %2077 = vst [vmem:[%s3346_s8 + $0x218] sm:$0xff] %v1495_v18  ;;  %v1682_v23 = vadd.f32 %v2449_v19, %v3490_v10  ;;  %v1673_v26 = vpop.f32.mrb[51].mxu0 }
 0x27d   : > { %2116 = vst [vmem:[%s3346_s8 + $0x280] sm:$0xff] %v1671_v21  ;;  %2075 = vst [vmem:[%s3346_s8 + $0x208] sm:$0xff] %v1487_v24  ;;  %v1674_v27 = vadd.f32 %v3490_v10, %v1673_v26 }
 0x27e   : > { %2119 = vst [vmem:[%s3346_s8 + $0x298] sm:$0xff] %v1682_v23 }
 0x27f   : > { %2117 = vst [vmem:[%s3346_s8 + $0x288] sm:$0xff] %v1674_v27  ;;  %v2420_v28 = vpop.f32.mrb[36].mxu1 }
 0x280   : > { %v1508_v29 = vadd.f32 %v2420_v28, %v3484_v1  ;;  %v1499_v31 = vpop.f32.mrb[37].mxu1 }
 0x281   : > { %v2452_v32 = vpop.f32.mrb[52].mxu0  ;;  %v1500_v33 = vadd.f32 %v3484_v1, %v1499_v31  ;;  %v2421_v35 = vpop.f32.mrb[38].mxu1 }
 0x282   : > { %2080 = vst [vmem:[%s3346_s8 + $0x230] sm:$0xff] %v1508_v29  ;;  %v1695_v36 = vadd.f32 %v2452_v32, %v3490_v10  ;;  %v1686_v37 = vpop.f32.mrb[53].mxu0  ;;  %v1511_v46 = vadd.f32 %v2421_v35, %v3484_v1  ;;  %v1502_v38 = vpop.f32.mrb[39].mxu1 }
 0x283   : > { %2078 = vst [vmem:[%s3346_s8 + $0x220] sm:$0xff] %v1500_v33  ;;  %v1687_v39 = vadd.f32 %v3490_v10, %v1686_v37  ;;  %v2453_v40 = vpop.f32.mrb[54].mxu0  ;;  %v1503_v54 = vadd.f32 %v3484_v1, %v1502_v38 }
 0x284   : > { %2122 = vst [vmem:[%s3346_s8 + $0x2b0] sm:$0xff] %v1695_v36  ;;  %2081 = vst [vmem:[%s3346_s8 + $0x238] sm:$0xff] %v1511_v46  ;;  %v1698_v49 = vadd.f32 %v2453_v40, %v3490_v10  ;;  %v1689_v60 = vpop.f32.mrb[55].mxu0 }
 0x285   : > { %2120 = vst [vmem:[%s3346_s8 + $0x2a0] sm:$0xff] %v1687_v39  ;;  %2079 = vst [vmem:[%s3346_s8 + $0x228] sm:$0xff] %v1503_v54  ;;  %v1690_v41 = vadd.f32 %v3490_v10, %v1689_v60 }
 0x286   : > { %2123 = vst [vmem:[%s3346_s8 + $0x2b8] sm:$0xff] %v1698_v49 }
 0x287   : > { %2121 = vst [vmem:[%s3346_s8 + $0x2a8] sm:$0xff] %v1690_v41  ;;  %v2424_v42 = vpop.f32.mrb[40].mxu1 }
 0x288   : > { %v1524_v43 = vadd.f32 %v2424_v42, %v3484_v1  ;;  %v1515_v47 = vpop.f32.mrb[41].mxu1 }
 0x289   : > { %v2456_v48 = vpop.f32.mrb[56].mxu0  ;;  %v1516_v50 = vadd.f32 %v3484_v1, %v1515_v47  ;;  %v2425_v51 = vpop.f32.mrb[42].mxu1 }
 0x28a   : > { %2084 = vst [vmem:[%s3346_s8 + $0x250] sm:$0xff] %v1524_v43  ;;  %v1711_v52 = vadd.f32 %v2456_v48, %v3490_v10  ;;  %v1702_v53 = vpop.f32.mrb[57].mxu0  ;;  %v1527_v16 = vadd.f32 %v2425_v51, %v3484_v1  ;;  %v1518_v25 = vpop.f32.mrb[43].mxu1 }
 0x28b   : > { %2082 = vst [vmem:[%s3346_s8 + $0x240] sm:$0xff] %v1516_v50  ;;  %v1703_v30 = vadd.f32 %v3490_v10, %v1702_v53  ;;  %v2457_v34 = vpop.f32.mrb[58].mxu0  ;;  %v1519_v56 = vadd.f32 %v3484_v1, %v1518_v25 }
 0x28c   : > { %2126 = vst [vmem:[%s3346_s8 + $0x2d0] sm:$0xff] %v1711_v52  ;;  %2085 = vst [vmem:[%s3346_s8 + $0x258] sm:$0xff] %v1527_v16  ;;  %v1714_v57 = vadd.f32 %v2457_v34, %v3490_v10  ;;  %v1705_v61 = vpop.f32.mrb[59].mxu0 }
 0x28d   : > { %2124 = vst [vmem:[%s3346_s8 + $0x2c0] sm:$0xff] %v1703_v30  ;;  %2083 = vst [vmem:[%s3346_s8 + $0x248] sm:$0xff] %v1519_v56  ;;  %v1706_v63 = vadd.f32 %v3490_v10, %v1705_v61 }
 0x28e   : > { %2127 = vst [vmem:[%s3346_s8 + $0x2d8] sm:$0xff] %v1714_v57 }
 0x28f   : > { %2125 = vst [vmem:[%s3346_s8 + $0x2c8] sm:$0xff] %v1706_v63  ;;  %v2428_v2 = vpop.f32.mrb[44].mxu1 }
 0x290   : > { %v1540_v3 = vadd.f32 %v2428_v2, %v3484_v1  ;;  %v1531_v55 = vpop.f32.mrb[45].mxu1 }
 0x291   : > { %v1532_v62 = vadd.f32 %v3484_v1, %v1531_v55  ;;  %v2429_v59 = vpop.f32.mrb[46].mxu1 }
 0x292   : > { %2088 = vst [vmem:[%s3346_s8 + $0x270] sm:$0xff] %v1540_v3  ;;  %v1543_v0 = vadd.f32 %v2429_v59, %v3484_v1  ;;  %v1534_v4 = vpop.f32.mrb[47].mxu1 }
 0x293   : > { %2086 = vst [vmem:[%s3346_s8 + $0x260] sm:$0xff] %v1532_v62  ;;  %v1535_v5 = vadd.f32 %v3484_v1, %v1534_v4 }
 0x294   : > { %2089 = vst [vmem:[%s3346_s8 + $0x278] sm:$0xff] %v1543_v0 }
 0x295   : > { %2087 = vst [vmem:[%s3346_s8 + $0x268] sm:$0xff] %v1535_v5 }
 0x297   : > { %v2460_v6 = vpop.f32.mrb[48].mxu1 }
 0x298   : > { %v1727_v7 = vadd.f32 %v2460_v6, %v3490_v10  ;;  %v1718_v8 = vpop.f32.mrb[49].mxu1 }
 0x299   : > { %v1719_v9 = vadd.f32 %v3490_v10, %v1718_v8  ;;  %v2461_v58 = vpop.f32.mrb[50].mxu1 }
 0x29a   : > { %2130 = vst [vmem:[%s3346_s8 + $0x2f0] sm:$0xff] %v1727_v7  ;;  %v1730_v12 = vadd.f32 %v2461_v58, %v3490_v10  ;;  %v1721_v44 = vpop.f32.mrb[51].mxu1 }
 0x29b   : > { %2128 = vst [vmem:[%s3346_s8 + $0x2e0] sm:$0xff] %v1719_v9  ;;  %v1722_v45 = vadd.f32 %v3490_v10, %v1721_v44 }
 0x29c   : > { %2131 = vst [vmem:[%s3346_s8 + $0x2f8] sm:$0xff] %v1730_v12 }
 0x29d   : > { %2129 = vst [vmem:[%s3346_s8 + $0x2e8] sm:$0xff] %v1722_v45 }
 0x29e   : > { %s2137_s30 = sshll.u32 %s2840_s25, 11  ;;  %s1780_s26 = sshll.u32 %s3346_s8, 4  ;;  %s1781_s26 = int_to_ptr.vmem [resolvable:$true] %s1780_s26 }
 0x29f   : > { %s1763_s29 = scalar_lea.hbm %s3600_s6, %s2137_s30  ;;  %s2777_s19 = smov 2048  }
 0x2a0   : > { %2485 = sst [smem:[#allocation9]] (%p2910_p12), %s2777_s19  ;;  %s2778_s16 = smov 4096  }
 0x2a1   : > { %2486 = sst [smem:[#allocation9 + $0x1]] (%p2910_p12), %s2778_s16  ;;  %s2779_s10 = smov 16  }
 0x2a2   : > { %2487 = sst [smem:[#allocation9 + $0x2]] (%p2910_p12), %s2779_s10  ;;  %s2780_s11 = smov 128  }
 0x2a3   : > { %2488 = sst [smem:[#allocation9 + $0x3]] (%p2910_p12), %s2780_s11  ;;  %s2781_s25 = smov 8  }
 0x2a4   : > { %2489 = sst [smem:[#allocation9 + $0x4]] (%p2910_p12), %s2780_s11  ;;  %s2782_s8 = smov [#allocation8]  }
 0x2a5   : > { %2490 = sst [smem:[#allocation9 + $0x5]] (%p2910_p12), %s2781_s25  ;;  %s2783_s15 = smov 0  }
 0x2a6   : > { %2491 = dma.general (%p2910_p12), %s1781_s26, 12288, %s1763_s29, %s1751_s7, %s2782_s8, [#allocation9], %s2783_s15, 0  }
 0x2a7 PF: > { %s1808_s20 = sand.u32 1, %s2757_s21   ;;  %p3615_p6 = scmp.ne.s32.totalorder %s3605_s28, 0 }
 0x2a8   : > { %p3616_p8 = scmp.ge.s32.totalorder %s2769_s24, 2  ;;  %s1809_s27 = scalar_lea.sflag [#allocation4], %s1808_s20 }
 0x2aa   : > { %p2502_p10 = pnand %p3616_p8, %p3615_p6 }
 0x2ac   : > { %2752 = dma.done.wait (!%p2502_p10), %s1809_s27, 12288  }
 0x2ad   : > { %2754 = vsyncadd (!%p2502_p10), %s1809_s27, 4294955008  ;;  %p20_p13 = scmp.ge.s32.totalorder %s2875_s9, 4   ;;  %s3617_s21 = smov %s2761_s22 }
 0x2ae   : > { %s3618_s22 = smov %s2765_s23  ;;  %s3619_s23 = smov %s2906_s13 }
 0x2af   : > { %s3620_s24 = smov %s2875_s9  ;;  %22 = sbr.rel (!%p20_p13) target bundleno = 6 (0x6), region = 116 }
 0x2b6   :  { %1814 = vsyncpa [#allocation3], 1 }
 0x2b7   :  { %1816 = vsyncpa [#allocation3 + $0x1], 1 }
 0x2b8   :  { %1817 = vsyncpa [#allocation6], 1 }
 0x2b9   :  { %1818 = vsyncpa [#allocation4], 1 }
 0x2ba   :  { %1820 = vsyncpa [#allocation4 + $0x1], 1 }

</bundles_post_ra>
